<compile_context>
chip_gen: v6e
topology: v6e:2x2x1
jax: 0.10.0
libtpu: 0.0.40
codegen_flags: <defaults>
</compile_context>

<pallas_src>
import functools

import jax
import jax.numpy as jnp
from jax.experimental import pallas as pl
from jax.experimental.pallas import tpu as pltpu

LEAKY_SLOPE = 0.01       # F.leaky_relu default negative_slope
IN_EPS = 1e-5            # F.instance_norm default eps
FC_PAD = 128             # lane-dense padding of the FC output column
VMEM_LIMIT = 32 * 1024 * 1024


# ----------------------------------------------------------------------------
# Pallas kernels
# ----------------------------------------------------------------------------
def _conv_fused_kernel(x_ref, w_ref, b_ref, o_ref, *, use_in):
    # x_ref: (S, K) bf16 im2col patches of ONE sample (leading batch dim squeezed)
    # w_ref: (K, TN) bf16   b_ref: (1, TN) f32   o_ref: (S, TN) f32
    z = jnp.dot(x_ref[...], w_ref[...], preferred_element_type=jnp.float32)
    z = z + b_ref[...]
    if use_in:
        # F.instance_norm: per-(sample, channel) over the spatial axis, biased variance.
        mean = jnp.mean(z, axis=0, keepdims=True)
        var = jnp.mean((z - mean) ** 2, axis=0, keepdims=True)
        z = (z - mean) * jax.lax.rsqrt(var + IN_EPS)
    o_ref[...] = jnp.where(z >= 0, z, LEAKY_SLOPE * z)


def conv_in_lrelu(patches, w_mat, bias, use_in):
    """patches: (B, S, K) bf16; w_mat: (K, N) bf16; bias: (N,) f32 -> (B, S, N) f32."""
    B, S, K = patches.shape
    K2, N = w_mat.shape
    assert K == K2
    TN = 128 if (N % 128 == 0) else N           # lane-dense output tiles when possible
    grid = (B, N // TN)
    bias2d = bias.reshape(1, N).astype(jnp.float32)
    kernel = functools.partial(_conv_fused_kernel, use_in=use_in)
    cost = pl.CostEstimate(
        flops=2 * B * S * K * N,
        transcendentals=(B * N) if use_in else 0,
        bytes_accessed=patches.size * 2 + w_mat.size * 2 + B * S * N * 4 + N * 4,
    )
    return pl.pallas_call(
        kernel,
        out_shape=jax.ShapeDtypeStruct((B, S, N), jnp.float32),
        grid=grid,
        in_specs=[
            pl.BlockSpec((None, S, K), lambda b, n: (b, 0, 0)),   # per-sample patches
            pl.BlockSpec((K, TN), lambda b, n: (0, n)),           # weight column tile
            pl.BlockSpec((1, TN), lambda b, n: (0, n)),           # bias column tile
        ],
        out_specs=pl.BlockSpec((None, S, TN), lambda b, n: (b, 0, n)),
        compiler_params=pltpu.CompilerParams(
            dimension_semantics=("parallel", "parallel"),
            vmem_limit_bytes=VMEM_LIMIT,
        ),
        cost_estimate=cost,
    )(patches, w_mat, bias2d)


def _fc_kernel(x_ref, w_ref, b_ref, sig_ref, logit_ref):
    # x: (B, F) bf16, w: (F, 128) bf16 (real weights in column 0), b: (1, 128) f32
    z = jnp.dot(x_ref[...], w_ref[...], preferred_element_type=jnp.float32)
    z = z + b_ref[...]
    logit_ref[...] = z
    sig_ref[...] = pl.reciprocal(1.0 + jnp.exp(-z), approx=True)   # EUP exp + vrcp


def fc_sigmoid(x, w_mat, bias2d):
    B, F = x.shape
    F2, N = w_mat.shape
    assert F == F2
    cost = pl.CostEstimate(
        flops=2 * B * F * N,
        transcendentals=2 * B * N,
        bytes_accessed=x.size * 2 + w_mat.size * 2 + 2 * B * N * 4,
    )
    vspec = pl.BlockSpec(memory_space=pltpu.MemorySpace.VMEM)
    return pl.pallas_call(
        _fc_kernel,
        out_shape=(jax.ShapeDtypeStruct((B, N), jnp.float32),
                   jax.ShapeDtypeStruct((B, N), jnp.float32)),
        in_specs=[vspec, vspec, vspec],
        out_specs=(vspec, vspec),
        compiler_params=pltpu.CompilerParams(vmem_limit_bytes=VMEM_LIMIT),
        cost_estimate=cost,
    )(x, w_mat, bias2d)


# ----------------------------------------------------------------------------
# Plain-JAX glue (patch extraction, weight layout, parameter setup)
# ----------------------------------------------------------------------------
def im2col_nhwc(x, k=4, s=2, p=1):
    """NHWC conv patches: (B, OH*OW, k*k*C) ordered (kh, kw, c), cast to bf16."""
    B, H, W, C = x.shape
    OH = (H + 2 * p - k) // s + 1
    OW = (W + 2 * p - k) // s + 1
    xp = jnp.pad(x, ((0, 0), (p, p), (p, p), (0, 0)))
    cols = []
    for kh in range(k):
        for kw in range(k):
            cols.append(xp[:, kh:kh + s * OH:s, kw:kw + s * OW:s, :])   # (B,OH,OW,C)
    patches = jnp.concatenate(cols, axis=-1)                            # (B,OH,OW,k*k*C)
    return patches.reshape(B, OH * OW, k * k * C).astype(jnp.bfloat16), OH, OW


def _conv_w_mat(w):
    # torch (Cout, Cin, KH, KW) -> (KH*KW*Cin, Cout), ordering matches im2col (kh,kw,c)
    cout = w.shape[0]
    return jnp.transpose(w, (2, 3, 1, 0)).reshape(-1, cout).astype(jnp.bfloat16)


def init_params(key, input_height, input_width, input_channels, num_filters):
    ks = jax.random.split(key, 5)

    def conv_w(k, cout, cin):
        return 0.02 * jax.random.normal(k, (cout, cin, 4, 4), jnp.float32)

    nf = num_filters
    fc_in = nf * 8 * (input_height // 16) * (input_width // 16)
    return {
        "conv1_w": conv_w(ks[0], nf, input_channels),
        "conv1_b": jnp.zeros((nf,), jnp.float32),
        "conv2_w": conv_w(ks[1], nf * 2, nf),
        "conv2_b": jnp.zeros((nf * 2,), jnp.float32),
        "conv3_w": conv_w(ks[2], nf * 4, nf * 2),
        "conv3_b": jnp.zeros((nf * 4,), jnp.float32),
        "conv4_w": conv_w(ks[3], nf * 8, nf * 4),
        "conv4_b": jnp.zeros((nf * 8,), jnp.float32),
        "fc_w": 0.02 * jax.random.normal(ks[4], (1, fc_in), jnp.float32),
        "fc_b": jnp.zeros((1,), jnp.float32),
    }


def discriminator_forward(params, x_nchw):
    B = x_nchw.shape[0]
    # One NCHW->NHWC transpose of the input; activations then stay NHWC throughout.
    h = jnp.transpose(x_nchw, (0, 2, 3, 1))

    layers = [("conv1", False), ("conv2", True), ("conv3", True), ("conv4", True)]
    for name, use_in in layers:
        w = params[f"{name}_w"]
        b = params[f"{name}_b"]
        patches, OH, OW = im2col_nhwc(h)
        y = conv_in_lrelu(patches, _conv_w_mat(w), b, use_in=use_in)   # (B, OH*OW, Cout)
        h = y.reshape(B, OH, OW, w.shape[0])                           # NHWC, no transpose

    _, Hf, Wf, C4 = h.shape
    flat = h.reshape(B, Hf * Wf * C4).astype(jnp.bfloat16)             # NHWC flatten order

    # Preserve torch.flatten(NCHW) semantics: permute the FC weight to NHWC order once,
    # then pad the single output column to 128 lanes (real result lives in column 0).
    fc_w = params["fc_w"].reshape(1, C4, Hf, Wf).transpose(0, 2, 3, 1).reshape(1, Hf * Wf * C4)
    fc_w = jnp.pad(fc_w.T, ((0, 0), (0, FC_PAD - 1))).astype(jnp.bfloat16)   # (F, 128)
    fc_b = jnp.pad(params["fc_b"].reshape(1, 1), ((0, 0), (0, FC_PAD - 1))).astype(jnp.float32)

    sig, logit = fc_sigmoid(flat, fc_w, fc_b)
    return sig[:, :1], logit[:, :1]


if __name__ == "__main__":
    # Small shapes consistent with the module: 4 stride-2 convs => H, W divisible by 16.
    B, CIN, H, W, NF = 2, 3, 32, 32, 8

    key = jax.random.PRNGKey(0)
    k_param, k_x = jax.random.split(key)
    params = init_params(k_param, H, W, CIN, NF)
    x = jax.random.normal(k_x, (B, CIN, H, W), jnp.float32)

    fwd = jax.jit(discriminator_forward)
    sig, logit = fwd(params, x)
    jax.block_until_ready((sig, logit))

    assert sig.shape == (B, 1) and logit.shape == (B, 1)
    assert bool(jnp.all(jnp.isfinite(sig))) and bool(jnp.all(jnp.isfinite(logit)))
    assert bool(jnp.all((sig >= 0.0) & (sig <= 1.0)))
    print("KERNEL_OK")
</pallas_src>

<mosaic_0001>
module attributes {stable_mosaic.version = 11 : i64} {
  func.func @_conv_fused_kernel(%arg0: i32, %arg1: i32, %arg2: memref<1x256x48xbf16, #tpu.memory_space<vmem>>, %arg3: memref<48x8xbf16, #tpu.memory_space<vmem>>, %arg4: memref<1x8xf32, #tpu.memory_space<vmem>>, %arg5: memref<1x256x8xf32, #tpu.memory_space<vmem>>) attributes {dimension_semantics = [#tpu.dimension_semantics<parallel>, #tpu.dimension_semantics<parallel>], iteration_bounds = array<i64: 2, 1>, scalar_prefetch = 0 : i64, scratch_operands = 0 : i64, tpu.core_type = #tpu.core_type<tc>, window_params = [{transform_indices = @transform_0, window_bounds = array<i64: 1, 256, 48>}, {transform_indices = @transform_1, window_bounds = array<i64: 48, 8>}, {transform_indices = @transform_2, window_bounds = array<i64: 1, 8>}, {transform_indices = @transform_3, window_bounds = array<i64: 1, 256, 8>}]} {
    %c0 = arith.constant 0 : index
    %c0_0 = arith.constant 0 : index
    %c0_1 = arith.constant 0 : index
    %0 = vector.load %arg2[%c0, %c0_0, %c0_1] : memref<1x256x48xbf16, #tpu.memory_space<vmem>>, vector<1x256x48xbf16>
    %1 = vector.shape_cast %0 : vector<1x256x48xbf16> to vector<256x48xbf16>
    %c0_2 = arith.constant 0 : index
    %c0_3 = arith.constant 0 : index
    %2 = vector.load %arg3[%c0_2, %c0_3] : memref<48x8xbf16, #tpu.memory_space<vmem>>, vector<48x8xbf16>
    %cst = arith.constant dense<0.000000e+00> : vector<256x8xf32>
    %3 = tpu.matmul %1, %2, %cst {dimension_numbers = #tpu.dot_dimension_numbers<[1], [0], [0], [1], [0, 0, 1, 1], [], []>} : vector<256x48xbf16>, vector<48x8xbf16>, vector<256x8xf32> -> vector<256x8xf32>
    %c0_4 = arith.constant 0 : index
    %c0_5 = arith.constant 0 : index
    %4 = vector.load %arg4[%c0_4, %c0_5] : memref<1x8xf32, #tpu.memory_space<vmem>>, vector<1x8xf32>
    %5 = vector.broadcast %4 : vector<1x8xf32> to vector<256x8xf32>
    %6 = arith.addf %3, %5 : vector<256x8xf32>
    %cst_6 = arith.constant 0.000000e+00 : f32
    %7 = vector.broadcast %cst_6 : f32 to vector<256x8xf32>
    %8 = arith.cmpf oge, %6, %7 : vector<256x8xf32>
    %cst_7 = arith.constant 0.00999999977 : f32
    %9 = vector.broadcast %cst_7 : f32 to vector<256x8xf32>
    %10 = arith.mulf %9, %6 : vector<256x8xf32>
    %11 = arith.select %8, %6, %10 : vector<256x8xi1>, vector<256x8xf32>
    %c0_8 = arith.constant 0 : index
    %c0_9 = arith.constant 0 : index
    %c0_10 = arith.constant 0 : index
    %12 = vector.load %arg5[%c0_8, %c0_9, %c0_10] : memref<1x256x8xf32, #tpu.memory_space<vmem>>, vector<1x256x8xf32>
    %13 = vector.shape_cast %12 : vector<1x256x8xf32> to vector<256x8xf32>
    %14 = vector.shape_cast %11 : vector<256x8xf32> to vector<1x256x8xf32>
    tpu.vector_store %arg5[%c0_8, %c0_9, %c0_10], %14 {strides = array<i32>} : memref<1x256x8xf32, #tpu.memory_space<vmem>>, vector<1x256x8xf32>,
    return
  }
  func.func @transform_0(%arg0: i32, %arg1: i32) -> (i32, i32, i32) {
    %c0_i32 = arith.constant 0 : i32
    %c0_i32_0 = arith.constant 0 : i32
    %c0_i32_1 = arith.constant 0 : i32
    return %arg0, %c0_i32, %c0_i32_0 : i32, i32, i32
  }
  func.func @transform_1(%arg0: i32, %arg1: i32) -> (i32, i32) {
    %c0_i32 = arith.constant 0 : i32
    %c0_i32_0 = arith.constant 0 : i32
    return %c0_i32, %arg1 : i32, i32
  }
  func.func @transform_2(%arg0: i32, %arg1: i32) -> (i32, i32) {
    %c0_i32 = arith.constant 0 : i32
    %c0_i32_0 = arith.constant 0 : i32
    return %c0_i32, %arg1 : i32, i32
  }
  func.func @transform_3(%arg0: i32, %arg1: i32) -> (i32, i32, i32) {
    %c0_i32 = arith.constant 0 : i32
    %c0_i32_0 = arith.constant 0 : i32
    return %arg0, %c0_i32, %arg1 : i32, i32, i32
  }
}

module attributes {stable_mosaic.version = 11 : i64} {
  func.func @_conv_fused_kernel(%arg0: i32, %arg1: i32, %arg2: memref<1x64x128xbf16, #tpu.memory_space<vmem>>, %arg3: memref<128x16xbf16, #tpu.memory_space<vmem>>, %arg4: memref<1x16xf32, #tpu.memory_space<vmem>>, %arg5: memref<1x64x16xf32, #tpu.memory_space<vmem>>) attributes {dimension_semantics = [#tpu.dimension_semantics<parallel>, #tpu.dimension_semantics<parallel>], iteration_bounds = array<i64: 2, 1>, scalar_prefetch = 0 : i64, scratch_operands = 0 : i64, tpu.core_type = #tpu.core_type<tc>, window_params = [{transform_indices = @transform_0, window_bounds = array<i64: 1, 64, 128>}, {transform_indices = @transform_1, window_bounds = array<i64: 128, 16>}, {transform_indices = @transform_2, window_bounds = array<i64: 1, 16>}, {transform_indices = @transform_3, window_bounds = array<i64: 1, 64, 16>}]} {
    %c0 = arith.constant 0 : index
    %c0_0 = arith.constant 0 : index
    %c0_1 = arith.constant 0 : index
    %0 = vector.load %arg2[%c0, %c0_0, %c0_1] : memref<1x64x128xbf16, #tpu.memory_space<vmem>>, vector<1x64x128xbf16>
    %1 = vector.shape_cast %0 : vector<1x64x128xbf16> to vector<64x128xbf16>
    %c0_2 = arith.constant 0 : index
    %c0_3 = arith.constant 0 : index
    %2 = vector.load %arg3[%c0_2, %c0_3] : memref<128x16xbf16, #tpu.memory_space<vmem>>, vector<128x16xbf16>
    %cst = arith.constant dense<0.000000e+00> : vector<64x16xf32>
    %3 = tpu.matmul %1, %2, %cst {dimension_numbers = #tpu.dot_dimension_numbers<[1], [0], [0], [1], [0, 0, 1, 1], [], []>} : vector<64x128xbf16>, vector<128x16xbf16>, vector<64x16xf32> -> vector<64x16xf32>
    %c0_4 = arith.constant 0 : index
    %c0_5 = arith.constant 0 : index
    %4 = vector.load %arg4[%c0_4, %c0_5] : memref<1x16xf32, #tpu.memory_space<vmem>>, vector<1x16xf32>
    %5 = vector.broadcast %4 : vector<1x16xf32> to vector<64x16xf32>
    %6 = arith.addf %3, %5 : vector<64x16xf32>
    %cst_6 = arith.constant dense<0.000000e+00> : vector<16xf32>
    %7 = vector.multi_reduction <add>, %6, %cst_6 [0] : vector<64x16xf32> to vector<16xf32>
    %8 = vector.shape_cast %7 : vector<16xf32> to vector<1x16xf32>
    %cst_7 = arith.constant 6.400000e+01 : f32
    %9 = vector.broadcast %cst_7 : f32 to vector<1x16xf32>
    %10 = arith.divf %8, %9 : vector<1x16xf32>
    %11 = vector.broadcast %10 : vector<1x16xf32> to vector<64x16xf32>
    %12 = arith.subf %6, %11 : vector<64x16xf32>
    %13 = arith.mulf %12, %12 : vector<64x16xf32>
    %cst_8 = arith.constant dense<0.000000e+00> : vector<16xf32>
    %14 = vector.multi_reduction <add>, %13, %cst_8 [0] : vector<64x16xf32> to vector<16xf32>
    %15 = vector.shape_cast %14 : vector<16xf32> to vector<1x16xf32>
    %cst_9 = arith.constant 6.400000e+01 : f32
    %16 = vector.broadcast %cst_9 : f32 to vector<1x16xf32>
    %17 = arith.divf %15, %16 : vector<1x16xf32>
    %18 = vector.broadcast %10 : vector<1x16xf32> to vector<64x16xf32>
    %19 = arith.subf %6, %18 : vector<64x16xf32>
    %cst_10 = arith.constant 9.99999974E-6 : f32
    %20 = vector.broadcast %cst_10 : f32 to vector<1x16xf32>
    %21 = arith.addf %17, %20 : vector<1x16xf32>
    %22 = math.rsqrt %21 : vector<1x16xf32>
    %23 = vector.broadcast %22 : vector<1x16xf32> to vector<64x16xf32>
    %24 = arith.mulf %19, %23 : vector<64x16xf32>
    %cst_11 = arith.constant 0.000000e+00 : f32
    %25 = vector.broadcast %cst_11 : f32 to vector<64x16xf32>
    %26 = arith.cmpf oge, %24, %25 : vector<64x16xf32>
    %cst_12 = arith.constant 0.00999999977 : f32
    %27 = vector.broadcast %cst_12 : f32 to vector<64x16xf32>
    %28 = arith.mulf %27, %24 : vector<64x16xf32>
    %29 = arith.select %26, %24, %28 : vector<64x16xi1>, vector<64x16xf32>
    %c0_13 = arith.constant 0 : index
    %c0_14 = arith.constant 0 : index
    %c0_15 = arith.constant 0 : index
    %30 = vector.load %arg5[%c0_13, %c0_14, %c0_15] : memref<1x64x16xf32, #tpu.memory_space<vmem>>, vector<1x64x16xf32>
    %31 = vector.shape_cast %30 : vector<1x64x16xf32> to vector<64x16xf32>
    %32 = vector.shape_cast %29 : vector<64x16xf32> to vector<1x64x16xf32>
    tpu.vector_store %arg5[%c0_13, %c0_14, %c0_15], %32 {strides = array<i32>} : memref<1x64x16xf32, #tpu.memory_space<vmem>>, vector<1x64x16xf32>,
    return
  }
  func.func @transform_0(%arg0: i32, %arg1: i32) -> (i32, i32, i32) {
    %c0_i32 = arith.constant 0 : i32
    %c0_i32_0 = arith.constant 0 : i32
    %c0_i32_1 = arith.constant 0 : i32
    return %arg0, %c0_i32, %c0_i32_0 : i32, i32, i32
  }
  func.func @transform_1(%arg0: i32, %arg1: i32) -> (i32, i32) {
    %c0_i32 = arith.constant 0 : i32
    %c0_i32_0 = arith.constant 0 : i32
    return %c0_i32, %arg1 : i32, i32
  }
  func.func @transform_2(%arg0: i32, %arg1: i32) -> (i32, i32) {
    %c0_i32 = arith.constant 0 : i32
    %c0_i32_0 = arith.constant 0 : i32
    return %c0_i32, %arg1 : i32, i32
  }
  func.func @transform_3(%arg0: i32, %arg1: i32) -> (i32, i32, i32) {
    %c0_i32 = arith.constant 0 : i32
    %c0_i32_0 = arith.constant 0 : i32
    return %arg0, %c0_i32, %arg1 : i32, i32, i32
  }
}

module attributes {stable_mosaic.version = 11 : i64} {
  func.func @_conv_fused_kernel(%arg0: i32, %arg1: i32, %arg2: memref<1x16x256xbf16, #tpu.memory_space<vmem>>, %arg3: memref<256x32xbf16, #tpu.memory_space<vmem>>, %arg4: memref<1x32xf32, #tpu.memory_space<vmem>>, %arg5: memref<1x16x32xf32, #tpu.memory_space<vmem>>) attributes {dimension_semantics = [#tpu.dimension_semantics<parallel>, #tpu.dimension_semantics<parallel>], iteration_bounds = array<i64: 2, 1>, scalar_prefetch = 0 : i64, scratch_operands = 0 : i64, tpu.core_type = #tpu.core_type<tc>, window_params = [{transform_indices = @transform_0, window_bounds = array<i64: 1, 16, 256>}, {transform_indices = @transform_1, window_bounds = array<i64: 256, 32>}, {transform_indices = @transform_2, window_bounds = array<i64: 1, 32>}, {transform_indices = @transform_3, window_bounds = array<i64: 1, 16, 32>}]} {
    %c0 = arith.constant 0 : index
    %c0_0 = arith.constant 0 : index
    %c0_1 = arith.constant 0 : index
    %0 = vector.load %arg2[%c0, %c0_0, %c0_1] : memref<1x16x256xbf16, #tpu.memory_space<vmem>>, vector<1x16x256xbf16>
    %1 = vector.shape_cast %0 : vector<1x16x256xbf16> to vector<16x256xbf16>
    %c0_2 = arith.constant 0 : index
    %c0_3 = arith.constant 0 : index
    %2 = vector.load %arg3[%c0_2, %c0_3] : memref<256x32xbf16, #tpu.memory_space<vmem>>, vector<256x32xbf16>
    %cst = arith.constant dense<0.000000e+00> : vector<16x32xf32>
    %3 = tpu.matmul %1, %2, %cst {dimension_numbers = #tpu.dot_dimension_numbers<[1], [0], [0], [1], [0, 0, 1, 1], [], []>} : vector<16x256xbf16>, vector<256x32xbf16>, vector<16x32xf32> -> vector<16x32xf32>
    %c0_4 = arith.constant 0 : index
    %c0_5 = arith.constant 0 : index
    %4 = vector.load %arg4[%c0_4, %c0_5] : memref<1x32xf32, #tpu.memory_space<vmem>>, vector<1x32xf32>
    %5 = vector.broadcast %4 : vector<1x32xf32> to vector<16x32xf32>
    %6 = arith.addf %3, %5 : vector<16x32xf32>
    %cst_6 = arith.constant dense<0.000000e+00> : vector<32xf32>
    %7 = vector.multi_reduction <add>, %6, %cst_6 [0] : vector<16x32xf32> to vector<32xf32>
    %8 = vector.shape_cast %7 : vector<32xf32> to vector<1x32xf32>
    %cst_7 = arith.constant 1.600000e+01 : f32
    %9 = vector.broadcast %cst_7 : f32 to vector<1x32xf32>
    %10 = arith.divf %8, %9 : vector<1x32xf32>
    %11 = vector.broadcast %10 : vector<1x32xf32> to vector<16x32xf32>
    %12 = arith.subf %6, %11 : vector<16x32xf32>
    %13 = arith.mulf %12, %12 : vector<16x32xf32>
    %cst_8 = arith.constant dense<0.000000e+00> : vector<32xf32>
    %14 = vector.multi_reduction <add>, %13, %cst_8 [0] : vector<16x32xf32> to vector<32xf32>
    %15 = vector.shape_cast %14 : vector<32xf32> to vector<1x32xf32>
    %cst_9 = arith.constant 1.600000e+01 : f32
    %16 = vector.broadcast %cst_9 : f32 to vector<1x32xf32>
    %17 = arith.divf %15, %16 : vector<1x32xf32>
    %18 = vector.broadcast %10 : vector<1x32xf32> to vector<16x32xf32>
    %19 = arith.subf %6, %18 : vector<16x32xf32>
    %cst_10 = arith.constant 9.99999974E-6 : f32
    %20 = vector.broadcast %cst_10 : f32 to vector<1x32xf32>
    %21 = arith.addf %17, %20 : vector<1x32xf32>
    %22 = math.rsqrt %21 : vector<1x32xf32>
    %23 = vector.broadcast %22 : vector<1x32xf32> to vector<16x32xf32>
    %24 = arith.mulf %19, %23 : vector<16x32xf32>
    %cst_11 = arith.constant 0.000000e+00 : f32
    %25 = vector.broadcast %cst_11 : f32 to vector<16x32xf32>
    %26 = arith.cmpf oge, %24, %25 : vector<16x32xf32>
    %cst_12 = arith.constant 0.00999999977 : f32
    %27 = vector.broadcast %cst_12 : f32 to vector<16x32xf32>
    %28 = arith.mulf %27, %24 : vector<16x32xf32>
    %29 = arith.select %26, %24, %28 : vector<16x32xi1>, vector<16x32xf32>
    %c0_13 = arith.constant 0 : index
    %c0_14 = arith.constant 0 : index
    %c0_15 = arith.constant 0 : index
    %30 = vector.load %arg5[%c0_13, %c0_14, %c0_15] : memref<1x16x32xf32, #tpu.memory_space<vmem>>, vector<1x16x32xf32>
    %31 = vector.shape_cast %30 : vector<1x16x32xf32> to vector<16x32xf32>
    %32 = vector.shape_cast %29 : vector<16x32xf32> to vector<1x16x32xf32>
    tpu.vector_store %arg5[%c0_13, %c0_14, %c0_15], %32 {strides = array<i32>} : memref<1x16x32xf32, #tpu.memory_space<vmem>>, vector<1x16x32xf32>,
    return
  }
  func.func @transform_0(%arg0: i32, %arg1: i32) -> (i32, i32, i32) {
    %c0_i32 = arith.constant 0 : i32
    %c0_i32_0 = arith.constant 0 : i32
    %c0_i32_1 = arith.constant 0 : i32
    return %arg0, %c0_i32, %c0_i32_0 : i32, i32, i32
  }
  func.func @transform_1(%arg0: i32, %arg1: i32) -> (i32, i32) {
    %c0_i32 = arith.constant 0 : i32
    %c0_i32_0 = arith.constant 0 : i32
    return %c0_i32, %arg1 : i32, i32
  }
  func.func @transform_2(%arg0: i32, %arg1: i32) -> (i32, i32) {
    %c0_i32 = arith.constant 0 : i32
    %c0_i32_0 = arith.constant 0 : i32
    return %c0_i32, %arg1 : i32, i32
  }
  func.func @transform_3(%arg0: i32, %arg1: i32) -> (i32, i32, i32) {
    %c0_i32 = arith.constant 0 : i32
    %c0_i32_0 = arith.constant 0 : i32
    return %arg0, %c0_i32, %arg1 : i32, i32, i32
  }
}

module attributes {stable_mosaic.version = 11 : i64} {
  func.func @_conv_fused_kernel(%arg0: i32, %arg1: i32, %arg2: memref<1x4x512xbf16, #tpu.memory_space<vmem>>, %arg3: memref<512x64xbf16, #tpu.memory_space<vmem>>, %arg4: memref<1x64xf32, #tpu.memory_space<vmem>>, %arg5: memref<1x4x64xf32, #tpu.memory_space<vmem>>) attributes {dimension_semantics = [#tpu.dimension_semantics<parallel>, #tpu.dimension_semantics<parallel>], iteration_bounds = array<i64: 2, 1>, scalar_prefetch = 0 : i64, scratch_operands = 0 : i64, tpu.core_type = #tpu.core_type<tc>, window_params = [{transform_indices = @transform_0, window_bounds = array<i64: 1, 4, 512>}, {transform_indices = @transform_1, window_bounds = array<i64: 512, 64>}, {transform_indices = @transform_2, window_bounds = array<i64: 1, 64>}, {transform_indices = @transform_3, window_bounds = array<i64: 1, 4, 64>}]} {
    %c0 = arith.constant 0 : index
    %c0_0 = arith.constant 0 : index
    %c0_1 = arith.constant 0 : index
    %0 = vector.load %arg2[%c0, %c0_0, %c0_1] : memref<1x4x512xbf16, #tpu.memory_space<vmem>>, vector<1x4x512xbf16>
    %1 = vector.shape_cast %0 : vector<1x4x512xbf16> to vector<4x512xbf16>
    %c0_2 = arith.constant 0 : index
    %c0_3 = arith.constant 0 : index
    %2 = vector.load %arg3[%c0_2, %c0_3] : memref<512x64xbf16, #tpu.memory_space<vmem>>, vector<512x64xbf16>
    %cst = arith.constant dense<0.000000e+00> : vector<4x64xf32>
    %3 = tpu.matmul %1, %2, %cst {dimension_numbers = #tpu.dot_dimension_numbers<[1], [0], [0], [1], [0, 0, 1, 1], [], []>} : vector<4x512xbf16>, vector<512x64xbf16>, vector<4x64xf32> -> vector<4x64xf32>
    %c0_4 = arith.constant 0 : index
    %c0_5 = arith.constant 0 : index
    %4 = vector.load %arg4[%c0_4, %c0_5] : memref<1x64xf32, #tpu.memory_space<vmem>>, vector<1x64xf32>
    %5 = vector.broadcast %4 : vector<1x64xf32> to vector<4x64xf32>
    %6 = arith.addf %3, %5 : vector<4x64xf32>
    %cst_6 = arith.constant dense<0.000000e+00> : vector<64xf32>
    %7 = vector.multi_reduction <add>, %6, %cst_6 [0] : vector<4x64xf32> to vector<64xf32>
    %8 = vector.shape_cast %7 : vector<64xf32> to vector<1x64xf32>
    %cst_7 = arith.constant 4.000000e+00 : f32
    %9 = vector.broadcast %cst_7 : f32 to vector<1x64xf32>
    %10 = arith.divf %8, %9 : vector<1x64xf32>
    %11 = vector.broadcast %10 : vector<1x64xf32> to vector<4x64xf32>
    %12 = arith.subf %6, %11 : vector<4x64xf32>
    %13 = arith.mulf %12, %12 : vector<4x64xf32>
    %cst_8 = arith.constant dense<0.000000e+00> : vector<64xf32>
    %14 = vector.multi_reduction <add>, %13, %cst_8 [0] : vector<4x64xf32> to vector<64xf32>
    %15 = vector.shape_cast %14 : vector<64xf32> to vector<1x64xf32>
    %cst_9 = arith.constant 4.000000e+00 : f32
    %16 = vector.broadcast %cst_9 : f32 to vector<1x64xf32>
    %17 = arith.divf %15, %16 : vector<1x64xf32>
    %18 = vector.broadcast %10 : vector<1x64xf32> to vector<4x64xf32>
    %19 = arith.subf %6, %18 : vector<4x64xf32>
    %cst_10 = arith.constant 9.99999974E-6 : f32
    %20 = vector.broadcast %cst_10 : f32 to vector<1x64xf32>
    %21 = arith.addf %17, %20 : vector<1x64xf32>
    %22 = math.rsqrt %21 : vector<1x64xf32>
    %23 = vector.broadcast %22 : vector<1x64xf32> to vector<4x64xf32>
    %24 = arith.mulf %19, %23 : vector<4x64xf32>
    %cst_11 = arith.constant 0.000000e+00 : f32
    %25 = vector.broadcast %cst_11 : f32 to vector<4x64xf32>
    %26 = arith.cmpf oge, %24, %25 : vector<4x64xf32>
    %cst_12 = arith.constant 0.00999999977 : f32
    %27 = vector.broadcast %cst_12 : f32 to vector<4x64xf32>
    %28 = arith.mulf %27, %24 : vector<4x64xf32>
    %29 = arith.select %26, %24, %28 : vector<4x64xi1>, vector<4x64xf32>
    %c0_13 = arith.constant 0 : index
    %c0_14 = arith.constant 0 : index
    %c0_15 = arith.constant 0 : index
    %30 = vector.load %arg5[%c0_13, %c0_14, %c0_15] : memref<1x4x64xf32, #tpu.memory_space<vmem>>, vector<1x4x64xf32>
    %31 = vector.shape_cast %30 : vector<1x4x64xf32> to vector<4x64xf32>
    %32 = vector.shape_cast %29 : vector<4x64xf32> to vector<1x4x64xf32>
    tpu.vector_store %arg5[%c0_13, %c0_14, %c0_15], %32 {strides = array<i32>} : memref<1x4x64xf32, #tpu.memory_space<vmem>>, vector<1x4x64xf32>,
    return
  }
  func.func @transform_0(%arg0: i32, %arg1: i32) -> (i32, i32, i32) {
    %c0_i32 = arith.constant 0 : i32
    %c0_i32_0 = arith.constant 0 : i32
    %c0_i32_1 = arith.constant 0 : i32
    return %arg0, %c0_i32, %c0_i32_0 : i32, i32, i32
  }
  func.func @transform_1(%arg0: i32, %arg1: i32) -> (i32, i32) {
    %c0_i32 = arith.constant 0 : i32
    %c0_i32_0 = arith.constant 0 : i32
    return %c0_i32, %arg1 : i32, i32
  }
  func.func @transform_2(%arg0: i32, %arg1: i32) -> (i32, i32) {
    %c0_i32 = arith.constant 0 : i32
    %c0_i32_0 = arith.constant 0 : i32
    return %c0_i32, %arg1 : i32, i32
  }
  func.func @transform_3(%arg0: i32, %arg1: i32) -> (i32, i32, i32) {
    %c0_i32 = arith.constant 0 : i32
    %c0_i32_0 = arith.constant 0 : i32
    return %arg0, %c0_i32, %arg1 : i32, i32, i32
  }
}

module attributes {stable_mosaic.version = 11 : i64} {
  func.func @_fc_kernel(%arg0: memref<2x256xbf16, #tpu.memory_space<vmem>>, %arg1: memref<256x128xbf16, #tpu.memory_space<vmem>>, %arg2: memref<1x128xf32, #tpu.memory_space<vmem>>, %arg3: memref<2x128xf32, #tpu.memory_space<vmem>>, %arg4: memref<2x128xf32, #tpu.memory_space<vmem>>) attributes {dimension_semantics = [], scalar_prefetch = 0 : i64, scratch_operands = 0 : i64, tpu.core_type = #tpu.core_type<tc>} {
    %c0 = arith.constant 0 : index
    %c0_0 = arith.constant 0 : index
    %0 = vector.load %arg0[%c0, %c0_0] : memref<2x256xbf16, #tpu.memory_space<vmem>>, vector<2x256xbf16>
    %c0_1 = arith.constant 0 : index
    %c0_2 = arith.constant 0 : index
    %1 = vector.load %arg1[%c0_1, %c0_2] : memref<256x128xbf16, #tpu.memory_space<vmem>>, vector<256x128xbf16>
    %cst = arith.constant dense<0.000000e+00> : vector<2x128xf32>
    %2 = tpu.matmul %0, %1, %cst {dimension_numbers = #tpu.dot_dimension_numbers<[1], [0], [0], [1], [0, 0, 1, 1], [], []>} : vector<2x256xbf16>, vector<256x128xbf16>, vector<2x128xf32> -> vector<2x128xf32>
    %c0_3 = arith.constant 0 : index
    %c0_4 = arith.constant 0 : index
    %3 = vector.load %arg2[%c0_3, %c0_4] : memref<1x128xf32, #tpu.memory_space<vmem>>, vector<1x128xf32>
    %4 = vector.broadcast %3 : vector<1x128xf32> to vector<2x128xf32>
    %5 = arith.addf %2, %4 : vector<2x128xf32>
    %c0_5 = arith.constant 0 : index
    %c0_6 = arith.constant 0 : index
    %6 = vector.load %arg4[%c0_5, %c0_6] : memref<2x128xf32, #tpu.memory_space<vmem>>, vector<2x128xf32>
    tpu.vector_store %arg4[%c0_5, %c0_6], %5 {strides = array<i32>} : memref<2x128xf32, #tpu.memory_space<vmem>>, vector<2x128xf32>,
    %cst_7 = arith.constant 0.000000e+00 : f32
    %7 = vector.broadcast %cst_7 : f32 to vector<2x128xf32>
    %8 = arith.subf %7, %5 : vector<2x128xf32>
    %9 = math.exp %8 : vector<2x128xf32>
    %cst_8 = arith.constant 1.000000e+00 : f32
    %10 = vector.broadcast %cst_8 : f32 to vector<2x128xf32>
    %11 = arith.addf %10, %9 : vector<2x128xf32>
    %12 = tpu.reciprocal %11 {approx = true} : vector<2x128xf32> -> vector<2x128xf32>
    %c0_9 = arith.constant 0 : index
    %c0_10 = arith.constant 0 : index
    %13 = vector.load %arg3[%c0_9, %c0_10] : memref<2x128xf32, #tpu.memory_space<vmem>>, vector<2x128xf32>
    tpu.vector_store %arg3[%c0_9, %c0_10], %12 {strides = array<i32>} : memref<2x128xf32, #tpu.memory_space<vmem>>, vector<2x128xf32>,
    return
  }
}

</mosaic_0001>

<bundles_post_ra>
// kernel: discriminator_forward.5
= control target key start
LH: loop header
LB: loop body
LE: loop exit
PB: predicated region body
PF: predicated region fallthrough
CT: control target
= control target key end

     0   :  { %s1011_s12 = smov 0   ;;  %s1013_s13 = smov 0   ;;  %s1194_s0 = inlined_call_operand.vmem [shape: bf16[2,256,48], index: 0, kind: input, shape index: {}]   ;;  %s1195_s1 = inlined_call_operand.vmem [shape: bf16[48,8], index: 1, kind: input, shape index: {}]   ;;  %s1196_s2 = inlined_call_operand.vmem [shape: f32[1,8], index: 2, kind: input, shape index: {}]   ;;  %s1197_s3 = inlined_call_operand.vmem [shape: f32[2,256,8], index: 3, kind: output, shape index: {}]  }
   0x1   :  { %s1015_s14 = smov 0  }
   0x2 LB: > { %s25_s15 = sadd.s32 1, %s985_s13  ;;  %p816_p0 = scmp.ge.s32.totalorder %s989_s14, 1  ;;  %s989_s14 = sphi %s1015_s14, %s13_s14   ;;  %s985_s13 = sphi %s1013_s13, %s1199_s13   ;;  %s981_s12 = sphi %s1011_s12, %s1198_s12  }
   0x3   : > { %p27_p1 = scmp.ge.s32.totalorder %s25_s15, 2  ;;  %p168_p2 = scmp.lt.s32.totalorder %s989_s14, 3 }
   0x5   : > { %s1201_s15 = smov (%p27_p1, %s25_s15), 0  ;;  %p169_p3 = pnand %p816_p0, %p168_p2 }
   0x6   : > { %p202_p4 = scmp.lt.s32.totalorder (!%p169_p3), %s981_s12, 1 }
   0x7   : > { %172 = sbr.rel (%p169_p3) target bundleno = 255 (0xff), region = 32 }
   0xc   : > { %v948_v0 = vld [vmem:[%s1195_s1 + $0x10] sm:$0xff]   ;;  %v949_v1 = vld [vmem:[%s1195_s1 + $0x8] sm:$0xff]   ;;  %s1203_s12 = smov (!%p202_p4, %s981_s12), 1  ;;  %v950_v2 = vld [vmem:[%s1195_s1] sm:$0xff]   ;;  %vm366_vm0 = vcmask 392192   ;;  %vm672_vm1 = vcmask 64512  }
   0xd   : > { %880 = vmatprep.subr.bf16.mxu0 %v948_v0  ;;  %918 = vmatprep.subr.bf16.mxu1 %v948_v0  ;;  %s859_s22 = sshll.u32 %s1203_s12, 7  ;;  %v1081_v19 = vld [vmem:[%s1196_s2] ss:$0 sm:$0xff]  ;;  %s860_s28 = sshll.u32 %s1203_s12, 8 }
   0xe   : > { %881 = vmatpush3.bf16.msra.mxu0 %v948_v0  ;;  %921 = vmatpush3.bf16.msra.mxu1 %v948_v0  ;;  %s1044_s25 = scalar_lea.vmem %s1194_s0, %s859_s22  ;;  %s1089_s4 = scalar_lea.vmem %s1197_s3, %s860_s28 }
   0xf   : > { %882 = vmatprep.subr.bf16.mxu0 %v949_v1  ;;  %919 = vmatprep.subr.bf16.mxu1 %v949_v1  ;;  %v951_v3 = vld [vmem:[%s1044_s25] sm:$0xff]   ;;  %v953_v5 = vld [vmem:[%s1044_s25 + $0x8] sm:$0xff]   ;;  %v955_v7 = vld [vmem:[%s1044_s25 + $0x10] sm:$0xff]  }
  0x10   : > { %v952_v4 = vld [vmem:[%s1044_s25 + $0x40] sm:$0xff]   ;;  %886 = vmatprep.mubr.msk.bf16.mxu0 %vm366_vm0, %v951_v3  ;;  %v954_v6 = vld [vmem:[%s1044_s25 + $0x48] sm:$0xff]   ;;  %v956_v8 = vld [vmem:[%s1044_s25 + $0x50] sm:$0xff]  }
  0x11   : > { %902 = vmatprep.mubr.msk.bf16.mxu1 %vm366_vm0, %v952_v4  ;;  %v957_v9 = vld [vmem:[%s1044_s25 + $0x18] sm:$0xff]   ;;  %v959_v11 = vld [vmem:[%s1044_s25 + $0x20] sm:$0xff]   ;;  %v961_v13 = vld [vmem:[%s1044_s25 + $0x28] sm:$0xff]  }
  0x12   : > { %883 = vmatpush3.bf16.msra.mxu0 %v949_v1  ;;  %922 = vmatpush3.bf16.msra.mxu1 %v949_v1  ;;  %v958_v10 = vld [vmem:[%s1044_s25 + $0x58] sm:$0xff]   ;;  %v960_v12 = vld [vmem:[%s1044_s25 + $0x60] sm:$0xff]   ;;  %v962_v14 = vld [vmem:[%s1044_s25 + $0x68] sm:$0xff]  }
  0x13   : > { %884 = vmatprep.subr.bf16.mxu0 %v950_v2  ;;  %920 = vmatprep.subr.bf16.mxu1 %v950_v2  ;;  %v963_v15 = vld [vmem:[%s1044_s25 + $0x30] sm:$0xff]   ;;  %v965_v17 = vld [vmem:[%s1044_s25 + $0x38] sm:$0xff]  }
  0x14   : > { %v964_v16 = vld [vmem:[%s1044_s25 + $0x70] sm:$0xff]   ;;  %v966_v18 = vld [vmem:[%s1044_s25 + $0x78] sm:$0xff]  }
  0x16   : > { %885 = vmatpush3.bf16.msra.mxu0 %v950_v2  ;;  %923 = vmatpush3.bf16.msra.mxu1 %v950_v2 }
  0x19   : > { %887 = vmatmul.mubr.msk.bf16.vlgmr.msra.gmra.mxu0 %vm366_vm0, %v953_v5  ;;  %903 = vmatmul.mubr.msk.bf16.vlgmr.msra.gmra.mxu1 %vm366_vm0, %v954_v6 }
  0x1a   : > { %890 = vmatprep.mubr.msk.bf16.mxu0 %vm366_vm0, %v955_v7  ;;  %906 = vmatprep.mubr.msk.bf16.mxu1 %vm366_vm0, %v956_v8 }
  0x21   : > { %891 = vmatmul.mubr.msk.bf16.gmra.mxu0 %vm366_vm0, %v957_v9  ;;  %907 = vmatmul.mubr.msk.bf16.gmra.mxu1 %vm366_vm0, %v958_v10 }
  0x22   : > { %894 = vmatprep.mubr.msk.bf16.mxu0 %vm366_vm0, %v959_v11  ;;  %910 = vmatprep.mubr.msk.bf16.mxu1 %vm366_vm0, %v960_v12 }
  0x29   : > { %895 = vmatmul.mubr.msk.bf16.gmra.mxu0 %vm366_vm0, %v961_v13  ;;  %911 = vmatmul.mubr.msk.bf16.gmra.mxu1 %vm366_vm0, %v962_v14 }
  0x2a   : > { %898 = vmatprep.mubr.msk.bf16.mxu0 %vm366_vm0, %v963_v15  ;;  %914 = vmatprep.mubr.msk.bf16.mxu1 %vm366_vm0, %v964_v16 }
  0x31   : > { %899 = vmatmul.mubr.msk.bf16.gmra.mxu0 %vm366_vm0, %v965_v17  ;;  %915 = vmatmul.mubr.msk.bf16.gmra.mxu1 %vm366_vm0, %v966_v18 }
  0xd9   : > { %v888_v20 = vpop.f32.mrf.mxu0  ;;  %v904_v21 = vpop.f32.mrf.mxu1 }
  0xda   : > { %v458_v22 = vadd.f32 %v888_v20, %v1081_v19  ;;  %v522_v23 = vadd.f32 %v904_v21, %v1081_v19 }
  0xdb   : > { %v449_v24 = vpop.f32.mrf.mxu0  ;;  %v513_v25 = vpop.f32.mrf.mxu1 }
  0xdc   : > { %vm578_vm2 = vcmp.ge.f32.partialorder %v458_v22, 0.0  ;;  %v610_v26 = vmul.f32 0.01, %v458_v22  ;;  %vm594_vm3 = vcmp.ge.f32.partialorder %v522_v23, 0.0  ;;  %v626_v27 = vmul.f32 0.01, %v522_v23 }
  0xdd   : > { %v450_v28 = vadd.f32 %v1081_v19, %v449_v24  ;;  %v514_v29 = vadd.f32 %v1081_v19, %v513_v25  ;;  %v889_v30 = vpop.f32.mrf.mxu0  ;;  %v905_v31 = vpop.f32.mrf.mxu1 }
  0xde   : > { %v642_v32 = vsel %vm578_vm2, %v458_v22, %v610_v26  ;;  %v658_v33 = vsel %vm594_vm3, %v522_v23, %v626_v27  ;;  %v461_v34 = vadd.f32 %v889_v30, %v1081_v19  ;;  %v525_v35 = vadd.f32 %v905_v31, %v1081_v19 }
  0xdf   : > { %675 = vst.msk [vmem:[%s1089_s4 + $0x10] sm:$0xff] %vm672_vm1, %v642_v32  ;;  %691 = vst.msk [vmem:[%s1089_s4 + $0x90] sm:$0xff] %vm672_vm1, %v658_v33  ;;  %vm576_vm4 = vcmp.ge.f32.partialorder %v450_v28, 0.0  ;;  %v608_v36 = vmul.f32 0.01, %v450_v28  ;;  %vm592_vm5 = vcmp.ge.f32.partialorder %v514_v29, 0.0  ;;  %v452_v38 = vpop.f32.mrf.mxu0  ;;  %v516_v39 = vpop.f32.mrf.mxu1 }
  0xe0   : > { %v624_v37 = vmul.f32 0.01, %v514_v29  ;;  %vm579_vm6 = vcmp.ge.f32.partialorder %v461_v34, 0.0  ;;  %v611_v40 = vmul.f32 0.01, %v461_v34  ;;  %vm595_vm7 = vcmp.ge.f32.partialorder %v525_v35, 0.0 }
  0xe1   : > { %v627_v41 = vmul.f32 0.01, %v525_v35  ;;  %v640_v42 = vsel %vm576_vm4, %v450_v28, %v608_v36  ;;  %v453_v44 = vadd.f32 %v1081_v19, %v452_v38  ;;  %v517_v45 = vadd.f32 %v1081_v19, %v516_v39  ;;  %v892_v46 = vpop.f32.mrf.mxu0  ;;  %v908_v47 = vpop.f32.mrf.mxu1 }
  0xe2   : > { %v656_v43 = vsel %vm592_vm5, %v514_v29, %v624_v37  ;;  %673 = vst.msk [vmem:[%s1089_s4] sm:$0xff] %vm672_vm1, %v640_v42  ;;  %v643_v48 = vsel %vm579_vm6, %v461_v34, %v611_v40  ;;  %v474_v50 = vadd.f32 %v892_v46, %v1081_v19  ;;  %v538_v51 = vadd.f32 %v908_v47, %v1081_v19 }
  0xe3   : > { %689 = vst.msk [vmem:[%s1089_s4 + $0x80] sm:$0xff] %vm672_vm1, %v656_v43  ;;  %v659_v49 = vsel %vm595_vm7, %v525_v35, %v627_v41  ;;  %676 = vst.msk [vmem:[%s1089_s4 + $0x18] sm:$0xff] %vm672_vm1, %v643_v48  ;;  %vm577_vm8 = vcmp.ge.f32.partialorder %v453_v44, 0.0  ;;  %v609_v52 = vmul.f32 0.01, %v453_v44  ;;  %vm593_vm9 = vcmp.ge.f32.partialorder %v517_v45, 0.0  ;;  %v465_v54 = vpop.f32.mrf.mxu0  ;;  %v529_v55 = vpop.f32.mrf.mxu1 }
  0xe4   : > { %692 = vst.msk [vmem:[%s1089_s4 + $0x98] sm:$0xff] %vm672_vm1, %v659_v49  ;;  %v625_v53 = vmul.f32 0.01, %v517_v45  ;;  %vm582_vm10 = vcmp.ge.f32.partialorder %v474_v50, 0.0  ;;  %v614_v56 = vmul.f32 0.01, %v474_v50  ;;  %v466_v60 = vadd.f32 %v1081_v19, %v465_v54 }
  0xe5   : > { %vm598_vm11 = vcmp.ge.f32.partialorder %v538_v51, 0.0  ;;  %v630_v57 = vmul.f32 0.01, %v538_v51  ;;  %v641_v58 = vsel %vm577_vm8, %v453_v44, %v609_v52  ;;  %v530_v61 = vadd.f32 %v1081_v19, %v529_v55  ;;  %v893_v62 = vpop.f32.mrf.mxu0  ;;  %v909_v63 = vpop.f32.mrf.mxu1 }
  0xe6   : > { %v657_v59 = vsel %vm593_vm9, %v517_v45, %v625_v53  ;;  %674 = vst.msk [vmem:[%s1089_s4 + $0x8] sm:$0xff] %vm672_vm1, %v641_v58  ;;  %v646_v0 = vsel %vm582_vm10, %v474_v50, %v614_v56  ;;  %v477_v2 = vadd.f32 %v893_v62, %v1081_v19  ;;  %v541_v3 = vadd.f32 %v909_v63, %v1081_v19 }
  0xe7   : > { %690 = vst.msk [vmem:[%s1089_s4 + $0x88] sm:$0xff] %vm672_vm1, %v657_v59  ;;  %v662_v1 = vsel %vm598_vm11, %v538_v51, %v630_v57  ;;  %679 = vst.msk [vmem:[%s1089_s4 + $0x30] sm:$0xff] %vm672_vm1, %v646_v0  ;;  %vm580_vm12 = vcmp.ge.f32.partialorder %v466_v60, 0.0  ;;  %v612_v4 = vmul.f32 0.01, %v466_v60  ;;  %vm596_vm13 = vcmp.ge.f32.partialorder %v530_v61, 0.0  ;;  %v468_v6 = vpop.f32.mrf.mxu0  ;;  %v532_v7 = vpop.f32.mrf.mxu1 }
  0xe8   : > { %695 = vst.msk [vmem:[%s1089_s4 + $0xb0] sm:$0xff] %vm672_vm1, %v662_v1  ;;  %v628_v5 = vmul.f32 0.01, %v530_v61  ;;  %vm583_vm14 = vcmp.ge.f32.partialorder %v477_v2, 0.0  ;;  %v615_v8 = vmul.f32 0.01, %v477_v2  ;;  %v469_v12 = vadd.f32 %v1081_v19, %v468_v6 }
  0xe9   : > { %vm599_vm15 = vcmp.ge.f32.partialorder %v541_v3, 0.0  ;;  %v631_v9 = vmul.f32 0.01, %v541_v3  ;;  %v644_v10 = vsel %vm580_vm12, %v466_v60, %v612_v4  ;;  %v533_v13 = vadd.f32 %v1081_v19, %v532_v7  ;;  %v896_v14 = vpop.f32.mrf.mxu0  ;;  %v912_v15 = vpop.f32.mrf.mxu1 }
  0xea   : > { %v660_v11 = vsel %vm596_vm13, %v530_v61, %v628_v5  ;;  %677 = vst.msk [vmem:[%s1089_s4 + $0x20] sm:$0xff] %vm672_vm1, %v644_v10  ;;  %v647_v16 = vsel %vm583_vm14, %v477_v2, %v615_v8  ;;  %v490_v18 = vadd.f32 %v896_v14, %v1081_v19  ;;  %v554_v20 = vadd.f32 %v912_v15, %v1081_v19 }
  0xeb   : > { %693 = vst.msk [vmem:[%s1089_s4 + $0xa0] sm:$0xff] %vm672_vm1, %v660_v11  ;;  %v663_v17 = vsel %vm599_vm15, %v541_v3, %v631_v9  ;;  %680 = vst.msk [vmem:[%s1089_s4 + $0x38] sm:$0xff] %vm672_vm1, %v647_v16  ;;  %vm581_vm0 = vcmp.ge.f32.partialorder %v469_v12, 0.0  ;;  %v613_v21 = vmul.f32 0.01, %v469_v12  ;;  %vm597_vm2 = vcmp.ge.f32.partialorder %v533_v13, 0.0  ;;  %v481_v23 = vpop.f32.mrf.mxu0  ;;  %v545_v24 = vpop.f32.mrf.mxu1 }
  0xec   : > { %696 = vst.msk [vmem:[%s1089_s4 + $0xb8] sm:$0xff] %vm672_vm1, %v663_v17  ;;  %v629_v22 = vmul.f32 0.01, %v533_v13  ;;  %vm586_vm3 = vcmp.ge.f32.partialorder %v490_v18, 0.0  ;;  %v618_v25 = vmul.f32 0.01, %v490_v18  ;;  %v482_v29 = vadd.f32 %v1081_v19, %v481_v23 }
  0xed   : > { %vm602_vm4 = vcmp.ge.f32.partialorder %v554_v20, 0.0  ;;  %v634_v26 = vmul.f32 0.01, %v554_v20  ;;  %v645_v27 = vsel %vm581_vm0, %v469_v12, %v613_v21  ;;  %v546_v30 = vadd.f32 %v1081_v19, %v545_v24  ;;  %v897_v31 = vpop.f32.mrf.mxu0  ;;  %v913_v32 = vpop.f32.mrf.mxu1 }
  0xee   : > { %v661_v28 = vsel %vm597_vm2, %v533_v13, %v629_v22  ;;  %678 = vst.msk [vmem:[%s1089_s4 + $0x28] sm:$0xff] %vm672_vm1, %v645_v27  ;;  %v650_v33 = vsel %vm586_vm3, %v490_v18, %v618_v25  ;;  %v493_v35 = vadd.f32 %v897_v31, %v1081_v19  ;;  %v557_v36 = vadd.f32 %v913_v32, %v1081_v19 }
  0xef   : > { %694 = vst.msk [vmem:[%s1089_s4 + $0xa8] sm:$0xff] %vm672_vm1, %v661_v28  ;;  %v666_v34 = vsel %vm602_vm4, %v554_v20, %v634_v26  ;;  %683 = vst.msk [vmem:[%s1089_s4 + $0x50] sm:$0xff] %vm672_vm1, %v650_v33  ;;  %vm584_vm5 = vcmp.ge.f32.partialorder %v482_v29, 0.0  ;;  %v616_v37 = vmul.f32 0.01, %v482_v29  ;;  %vm600_vm6 = vcmp.ge.f32.partialorder %v546_v30, 0.0  ;;  %v484_v39 = vpop.f32.mrf.mxu0  ;;  %v548_v40 = vpop.f32.mrf.mxu1 }
  0xf0   : > { %699 = vst.msk [vmem:[%s1089_s4 + $0xd0] sm:$0xff] %vm672_vm1, %v666_v34  ;;  %v632_v38 = vmul.f32 0.01, %v546_v30  ;;  %vm587_vm7 = vcmp.ge.f32.partialorder %v493_v35, 0.0  ;;  %v619_v41 = vmul.f32 0.01, %v493_v35  ;;  %v485_v45 = vadd.f32 %v1081_v19, %v484_v39 }
  0xf1   : > { %vm603_vm8 = vcmp.ge.f32.partialorder %v557_v36, 0.0  ;;  %v635_v42 = vmul.f32 0.01, %v557_v36  ;;  %v648_v43 = vsel %vm584_vm5, %v482_v29, %v616_v37  ;;  %v549_v46 = vadd.f32 %v1081_v19, %v548_v40  ;;  %v900_v47 = vpop.f32.mrf.mxu0  ;;  %v916_v48 = vpop.f32.mrf.mxu1 }
  0xf2   : > { %v664_v44 = vsel %vm600_vm6, %v546_v30, %v632_v38  ;;  %681 = vst.msk [vmem:[%s1089_s4 + $0x40] sm:$0xff] %vm672_vm1, %v648_v43  ;;  %v651_v49 = vsel %vm587_vm7, %v493_v35, %v619_v41  ;;  %v506_v51 = vadd.f32 %v900_v47, %v1081_v19  ;;  %v570_v52 = vadd.f32 %v916_v48, %v1081_v19 }
  0xf3   : > { %697 = vst.msk [vmem:[%s1089_s4 + $0xc0] sm:$0xff] %vm672_vm1, %v664_v44  ;;  %v667_v50 = vsel %vm603_vm8, %v557_v36, %v635_v42  ;;  %684 = vst.msk [vmem:[%s1089_s4 + $0x58] sm:$0xff] %vm672_vm1, %v651_v49  ;;  %vm585_vm9 = vcmp.ge.f32.partialorder %v485_v45, 0.0  ;;  %v617_v53 = vmul.f32 0.01, %v485_v45  ;;  %vm601_vm10 = vcmp.ge.f32.partialorder %v549_v46, 0.0  ;;  %v497_v55 = vpop.f32.mrf.mxu0  ;;  %v561_v56 = vpop.f32.mrf.mxu1 }
  0xf4   : > { %700 = vst.msk [vmem:[%s1089_s4 + $0xd8] sm:$0xff] %vm672_vm1, %v667_v50  ;;  %v633_v54 = vmul.f32 0.01, %v549_v46  ;;  %vm590_vm11 = vcmp.ge.f32.partialorder %v506_v51, 0.0  ;;  %v622_v57 = vmul.f32 0.01, %v506_v51  ;;  %v498_v61 = vadd.f32 %v1081_v19, %v497_v55 }
  0xf5   : > { %vm606_vm12 = vcmp.ge.f32.partialorder %v570_v52, 0.0  ;;  %v638_v58 = vmul.f32 0.01, %v570_v52  ;;  %v649_v59 = vsel %vm585_vm9, %v485_v45, %v617_v53  ;;  %v562_v62 = vadd.f32 %v1081_v19, %v561_v56  ;;  %v901_v63 = vpop.f32.mrf.mxu0  ;;  %v917_v0 = vpop.f32.mrf.mxu1 }
  0xf6   : > { %v665_v60 = vsel %vm601_vm10, %v549_v46, %v633_v54  ;;  %682 = vst.msk [vmem:[%s1089_s4 + $0x48] sm:$0xff] %vm672_vm1, %v649_v59  ;;  %v654_v1 = vsel %vm590_vm11, %v506_v51, %v622_v57  ;;  %v509_v3 = vadd.f32 %v901_v63, %v1081_v19  ;;  %v573_v4 = vadd.f32 %v917_v0, %v1081_v19 }
  0xf7   : > { %698 = vst.msk [vmem:[%s1089_s4 + $0xc8] sm:$0xff] %vm672_vm1, %v665_v60  ;;  %v670_v2 = vsel %vm606_vm12, %v570_v52, %v638_v58  ;;  %687 = vst.msk [vmem:[%s1089_s4 + $0x70] sm:$0xff] %vm672_vm1, %v654_v1  ;;  %vm588_vm13 = vcmp.ge.f32.partialorder %v498_v61, 0.0  ;;  %v620_v5 = vmul.f32 0.01, %v498_v61  ;;  %vm604_vm14 = vcmp.ge.f32.partialorder %v562_v62, 0.0  ;;  %v500_v7 = vpop.f32.mrf.mxu0  ;;  %v564_v8 = vpop.f32.mrf.mxu1 }
  0xf8   : > { %703 = vst.msk [vmem:[%s1089_s4 + $0xf0] sm:$0xff] %vm672_vm1, %v670_v2  ;;  %v636_v6 = vmul.f32 0.01, %v562_v62  ;;  %vm591_vm15 = vcmp.ge.f32.partialorder %v509_v3, 0.0  ;;  %v623_v9 = vmul.f32 0.01, %v509_v3  ;;  %v501_v13 = vadd.f32 %v1081_v19, %v500_v7 }
  0xf9   : > { %vm607_vm0 = vcmp.ge.f32.partialorder %v573_v4, 0.0  ;;  %v639_v10 = vmul.f32 0.01, %v573_v4  ;;  %v652_v11 = vsel %vm588_vm13, %v498_v61, %v620_v5  ;;  %v565_v14 = vadd.f32 %v1081_v19, %v564_v8 }
  0xfa   : > { %v668_v12 = vsel %vm604_vm14, %v562_v62, %v636_v6  ;;  %685 = vst.msk [vmem:[%s1089_s4 + $0x60] sm:$0xff] %vm672_vm1, %v652_v11  ;;  %v655_v15 = vsel %vm591_vm15, %v509_v3, %v623_v9  ;;  %vm589_vm2 = vcmp.ge.f32.partialorder %v501_v13, 0.0  ;;  %v621_v17 = vmul.f32 0.01, %v501_v13 }
  0xfb   : > { %701 = vst.msk [vmem:[%s1089_s4 + $0xe0] sm:$0xff] %vm672_vm1, %v668_v12  ;;  %v671_v16 = vsel %vm607_vm0, %v573_v4, %v639_v10  ;;  %688 = vst.msk [vmem:[%s1089_s4 + $0x78] sm:$0xff] %vm672_vm1, %v655_v15  ;;  %vm605_vm3 = vcmp.ge.f32.partialorder %v565_v14, 0.0  ;;  %v637_v18 = vmul.f32 0.01, %v565_v14 }
  0xfc   : > { %704 = vst.msk [vmem:[%s1089_s4 + $0xf8] sm:$0xff] %vm672_vm1, %v671_v16  ;;  %v653_v20 = vsel %vm589_vm2, %v501_v13, %v621_v17 }
  0xfd   : > { %v669_v21 = vsel %vm605_vm3, %v565_v14, %v637_v18  ;;  %686 = vst.msk [vmem:[%s1089_s4 + $0x68] sm:$0xff] %vm672_vm1, %v653_v20 }
  0xfe   : > { %702 = vst.msk [vmem:[%s1089_s4 + $0xe8] sm:$0xff] %vm672_vm1, %v669_v21 }
  0xff PF: > { %s13_s14 = sadd.s32 1, %s989_s14   ;;  %s1198_s12 = smov %s985_s13 }
 0x100   : > { %p10_p5 = scmp.ge.s32.totalorder %s13_s14, 4   ;;  %s1199_s13 = smov %s1201_s15 }
 0x102   :  { %12 = sbr.rel (!%p10_p5) target bundleno = 2 (0x2), region = 68 }

// kernel: discriminator_forward.6
= control target key start
LH: loop header
LB: loop body
LE: loop exit
PB: predicated region body
PF: predicated region fallthrough
CT: control target
= control target key end

     0   :  { %s762_s12 = smov 0   ;;  %s764_s13 = smov 0   ;;  %s864_s0 = inlined_call_operand.vmem [shape: bf16[2,64,128], index: 0, kind: input, shape index: {}]   ;;  %s865_s1 = inlined_call_operand.vmem [shape: bf16[128,16], index: 1, kind: input, shape index: {}]   ;;  %s866_s2 = inlined_call_operand.vmem [shape: f32[1,16], index: 2, kind: input, shape index: {}]   ;;  %s867_s3 = inlined_call_operand.vmem [shape: f32[2,64,16], index: 3, kind: output, shape index: {}]  }
   0x1   :  { %s766_s14 = smov 0  }
   0x2 LB: > { %s25_s15 = sadd.s32 1, %s736_s13  ;;  %p606_p0 = scmp.ge.s32.totalorder %s740_s14, 1  ;;  %s740_s14 = sphi %s766_s14, %s13_s14   ;;  %s736_s13 = sphi %s764_s13, %s869_s13   ;;  %s732_s12 = sphi %s762_s12, %s868_s12  }
   0x3   : > { %p27_p1 = scmp.ge.s32.totalorder %s25_s15, 2  ;;  %p168_p2 = scmp.lt.s32.totalorder %s740_s14, 3 }
   0x5   : > { %s871_s15 = smov (%p27_p1, %s25_s15), 0  ;;  %p169_p3 = pnand %p606_p0, %p168_p2 }
   0x6   : > { %p202_p4 = scmp.lt.s32.totalorder (!%p169_p3), %s732_s12, 1 }
   0x7   : > { %172 = sbr.rel (%p169_p3) target bundleno = 336 (0x150), region = 32 }
   0xc   : > { %v704_v0 = vld [vmem:[%s865_s1 + $0x38] sm:$0xff]   ;;  %v705_v1 = vld [vmem:[%s865_s1 + $0x30] sm:$0xff]   ;;  %s873_s12 = smov (!%p202_p4, %s732_s12), 1  ;;  %v706_v2 = vld [vmem:[%s865_s1 + $0x28] sm:$0xff]   ;;  %vm391_vm0 = vcmask 130048  }
   0xd   : > { %640 = vmatprep.subr.bf16.mxu0 %v704_v0  ;;  %664 = vmatprep.subr.bf16.mxu1 %v704_v0  ;;  %s626_s22 = sshll.u32 %s873_s12, 5  ;;  %v707_v3 = vld [vmem:[%s865_s1 + $0x20] sm:$0xff]   ;;  %v708_v6 = vld [vmem:[%s865_s1 + $0x18] sm:$0xff]   ;;  %v709_v7 = vld [vmem:[%s865_s1 + $0x10] sm:$0xff]   ;;  %s627_s11 = sshll.u32 %s873_s12, 6 }
   0xe   : > { %641 = vmatpush3.bf16.msra.mxu0 %v704_v0  ;;  %672 = vmatpush3.bf16.msra.mxu1 %v704_v0  ;;  %s795_s25 = scalar_lea.vmem %s864_s0, %s626_s22  ;;  %v710_v8 = vld [vmem:[%s865_s1 + $0x8] sm:$0xff]   ;;  %v711_v9 = vld [vmem:[%s865_s1] sm:$0xff]   ;;  %s221_s18 = scalar_lea.vmem %s867_s3, %s627_s11 }
   0xf   : > { %642 = vmatprep.subr.bf16.mxu0 %v705_v1  ;;  %665 = vmatprep.subr.bf16.mxu1 %v705_v1  ;;  %v712_v4 = vld [vmem:[%s795_s25] sm:$0xff]   ;;  %v714_v5 = vld [vmem:[%s795_s25 + $0x10] sm:$0xff]   ;;  %v713_v10 = vld [vmem:[%s795_s25 + $0x8] sm:$0xff]  }
  0x10   : > { %656 = vmatprep.mubr.bf16.mxu0 %v712_v4  ;;  %660 = vmatprep.mubr.bf16.mxu1 %v714_v5  ;;  %v715_v11 = vld [vmem:[%s795_s25 + $0x18] sm:$0xff]   ;;  %v611_v16 = vld [vmem:[%s866_s2] ss:$0 sm:$0xff] }
  0x12   : > { %643 = vmatpush3.bf16.msra.mxu0 %v705_v1  ;;  %673 = vmatpush3.bf16.msra.mxu1 %v705_v1 }
  0x13   : > { %644 = vmatprep.subr.bf16.mxu0 %v706_v2  ;;  %666 = vmatprep.subr.bf16.mxu1 %v706_v2 }
  0x16   : > { %645 = vmatpush3.bf16.msra.mxu0 %v706_v2  ;;  %674 = vmatpush3.bf16.msra.mxu1 %v706_v2 }
  0x17   : > { %646 = vmatprep.subr.bf16.mxu0 %v707_v3  ;;  %667 = vmatprep.subr.bf16.mxu1 %v707_v3 }
  0x1a   : > { %647 = vmatpush3.bf16.msra.mxu0 %v707_v3  ;;  %675 = vmatpush3.bf16.msra.mxu1 %v707_v3 }
  0x1b   : > { %648 = vmatprep.subr.bf16.mxu0 %v708_v6  ;;  %668 = vmatprep.subr.bf16.mxu1 %v708_v6 }
  0x1e   : > { %649 = vmatpush3.bf16.msra.mxu0 %v708_v6  ;;  %676 = vmatpush3.bf16.msra.mxu1 %v708_v6 }
  0x1f   : > { %650 = vmatprep.subr.bf16.mxu0 %v709_v7  ;;  %669 = vmatprep.subr.bf16.mxu1 %v709_v7 }
  0x22   : > { %651 = vmatpush3.bf16.msra.mxu0 %v709_v7  ;;  %677 = vmatpush3.bf16.msra.mxu1 %v709_v7 }
  0x23   : > { %652 = vmatprep.subr.bf16.mxu0 %v710_v8  ;;  %670 = vmatprep.subr.bf16.mxu1 %v710_v8 }
  0x26   : > { %653 = vmatpush3.bf16.msra.mxu0 %v710_v8  ;;  %678 = vmatpush3.bf16.msra.mxu1 %v710_v8 }
  0x27   : > { %654 = vmatprep.subr.bf16.mxu0 %v711_v9  ;;  %671 = vmatprep.subr.bf16.mxu1 %v711_v9 }
  0x2a   : > { %655 = vmatpush3.bf16.msra.mxu0 %v711_v9  ;;  %679 = vmatpush3.bf16.msra.mxu1 %v711_v9 }
  0x2d   : > { %657 = vmatmul.mubr.bf16.vlgmr.msra.gmra.mxu0 %v713_v10  ;;  %661 = vmatmul.mubr.bf16.vlgmr.msra.gmra.mxu1 %v715_v11 }
  0xed   : > { %v658_v12 = vpop.f32.mrf.mxu0  ;;  %v662_v13 = vpop.f32.mrf.mxu1 }
  0xee   : > { %v369_v21 = vadd.f32 %v658_v12, %v611_v16  ;;  %v385_v34 = vadd.f32 %v662_v13, %v611_v16 }
  0xef   : > { %v360_v14 = vpop.f32.mrf.mxu0  ;;  %v376_v15 = vpop.f32.mrf.mxu1 }
  0xf0   : > { %v361_v18 = vadd.f32 %v611_v16, %v360_v14  ;;  %v395_v28 = vsel %vm391_vm0, %v369_v21, 0.0  ;;  %v377_v29 = vadd.f32 %v611_v16, %v376_v15  ;;  %v403_v40 = vsel %vm391_vm0, %v385_v34, 0.0 }
  0xf1   : > { %v659_v17 = vpop.f32.mrf.mxu0  ;;  %v663_v20 = vpop.f32.mrf.mxu1 }
  0xf2   : > { %v392_v23 = vsel %vm391_vm0, %v361_v18, 0.0  ;;  %v372_v24 = vadd.f32 %v659_v17, %v611_v16  ;;  %v399_v35 = vsel %vm391_vm0, %v377_v29, 0.0  ;;  %v388_v37 = vadd.f32 %v663_v20, %v611_v16 }
  0xf3   : > { %v363_v19 = vpop.f32.mrf.mxu0  ;;  %v379_v27 = vpop.f32.mrf.mxu1 }
  0xf4   : > { %v364_v22 = vadd.f32 %v611_v16, %v363_v19  ;;  %v397_v31 = vsel %vm391_vm0, %v372_v24, 0.0  ;;  %v380_v32 = vadd.f32 %v611_v16, %v379_v27  ;;  %v405_v42 = vsel %vm391_vm0, %v388_v37, 0.0 }
  0xf6   : > { %v393_v25 = vsel %vm391_vm0, %v364_v22, 0.0  ;;  %v401_v38 = vsel %vm391_vm0, %v380_v32, 0.0 }
  0xf7   : > { %v394_v26 = vadd.f32 %v393_v25, %v392_v23 }
  0xf9   : > { %v396_v30 = vadd.f32 %v395_v28, %v394_v26 }
  0xfb   : > { %v398_v33 = vadd.f32 %v397_v31, %v396_v30 }
  0xfd   : > { %v400_v36 = vadd.f32 %v399_v35, %v398_v33 }
  0xff   : > { %v402_v39 = vadd.f32 %v401_v38, %v400_v36 }
 0x101   : > { %v404_v41 = vadd.f32 %v403_v40, %v402_v39 }
 0x103   : > { %v406_v43 = vadd.f32 %v405_v42, %v404_v41 }
 0x105   : > { %v407_v44 = vrot.slane %v406_v43, 4 }
 0x107   : > { %v408_v45 = vadd.f32 %v407_v44, %v406_v43 }
 0x109   : > { %v409_v46 = vrot.slane %v408_v45, 2 }
 0x10b   : > { %v410_v47 = vadd.f32 %v409_v46, %v408_v45 }
 0x10d   : > { %v411_v48 = vrot.slane %v410_v47, 1 }
 0x10f   : > { %v412_v49 = vadd.f32 %v411_v48, %v410_v47 }
 0x111   : > { %v414_v50 = vmul.f32 0.015625, %v412_v49 }
 0x113   : > { %v415_v51 = vsub.f32 %v361_v18, %v414_v50  ;;  %v416_v52 = vsub.f32 %v364_v22, %v414_v50  ;;  %v417_v53 = vsub.f32 %v369_v21, %v414_v50  ;;  %v418_v54 = vsub.f32 %v372_v24, %v414_v50 }
 0x114   : > { %v419_v55 = vsub.f32 %v377_v29, %v414_v50  ;;  %v420_v59 = vsub.f32 %v380_v32, %v414_v50  ;;  %v421_v0 = vsub.f32 %v385_v34, %v414_v50  ;;  %v422_v4 = vsub.f32 %v388_v37, %v414_v50 }
 0x115   : > { %v423_v56 = vmul.f32 %v415_v51, %v415_v51  ;;  %v424_v57 = vmul.f32 %v416_v52, %v416_v52  ;;  %v425_v58 = vmul.f32 %v417_v53, %v417_v53  ;;  %v426_v60 = vmul.f32 %v418_v54, %v418_v54 }
 0x116   : > { %v427_v1 = vmul.f32 %v419_v55, %v419_v55  ;;  %v428_v5 = vmul.f32 %v420_v59, %v420_v59  ;;  %v429_v8 = vmul.f32 %v421_v0, %v421_v0  ;;  %v430_v11 = vmul.f32 %v422_v4, %v422_v4 }
 0x117   : > { %v431_v61 = vsel %vm391_vm0, %v423_v56, 0.0  ;;  %v432_v62 = vsel %vm391_vm0, %v424_v57, 0.0  ;;  %v434_v2 = vsel %vm391_vm0, %v425_v58, 0.0  ;;  %v436_v6 = vsel %vm391_vm0, %v426_v60, 0.0 }
 0x118   : > { %v433_v63 = vadd.f32 %v432_v62, %v431_v61  ;;  %v438_v9 = vsel %vm391_vm0, %v427_v1, 0.0  ;;  %v440_v12 = vsel %vm391_vm0, %v428_v5, 0.0  ;;  %v442_v14 = vsel %vm391_vm0, %v429_v8, 0.0 }
 0x119   : > { %v444_v16 = vsel %vm391_vm0, %v430_v11, 0.0 }
 0x11a   : > { %v435_v3 = vadd.f32 %v434_v2, %v433_v63 }
 0x11c   : > { %v437_v7 = vadd.f32 %v436_v6, %v435_v3 }
 0x11e   : > { %v439_v10 = vadd.f32 %v438_v9, %v437_v7 }
 0x120   : > { %v441_v13 = vadd.f32 %v440_v12, %v439_v10 }
 0x122   : > { %v443_v15 = vadd.f32 %v442_v14, %v441_v13 }
 0x124   : > { %v445_v17 = vadd.f32 %v444_v16, %v443_v15 }
 0x126   : > { %v446_v18 = vrot.slane %v445_v17, 4 }
 0x128   : > { %v447_v19 = vadd.f32 %v446_v18, %v445_v17 }
 0x12a   : > { %v448_v20 = vrot.slane %v447_v19, 2 }
 0x12c   : > { %v449_v21 = vadd.f32 %v448_v20, %v447_v19 }
 0x12e   : > { %v450_v22 = vrot.slane %v449_v21, 1 }
 0x130   : > { %v451_v23 = vadd.f32 %v450_v22, %v449_v21 }
 0x132   : > { %v452_v24 = vmul.f32 0.015625, %v451_v23 }
 0x134   : > { %v453_v25 = vadd.f32 1e-05, %v452_v24 }
 0x136   : > { %716 = vrsqrt.f32 %v453_v25 }
 0x143   : > { %v717_v26 = vpop.eup %716 }
 0x144   : > { %v455_v27 = vmul.f32 %v717_v26, %v415_v51  ;;  %v456_v28 = vmul.f32 %v717_v26, %v416_v52  ;;  %v457_v29 = vmul.f32 %v717_v26, %v417_v53  ;;  %v458_v30 = vmul.f32 %v717_v26, %v418_v54 }
 0x145   : > { %v459_v31 = vmul.f32 %v717_v26, %v419_v55  ;;  %v460_v32 = vmul.f32 %v717_v26, %v420_v59  ;;  %v461_v33 = vmul.f32 %v717_v26, %v421_v0  ;;  %v462_v34 = vmul.f32 %v717_v26, %v422_v4 }
 0x146   : > { %vm463_vm1 = vcmp.ge.f32.partialorder %v455_v27, 0.0  ;;  %vm464_vm2 = vcmp.ge.f32.partialorder %v456_v28, 0.0  ;;  %vm465_vm3 = vcmp.ge.f32.partialorder %v457_v29, 0.0  ;;  %vm466_vm4 = vcmp.ge.f32.partialorder %v458_v30, 0.0 }
 0x147   : > { %vm467_vm5 = vcmp.ge.f32.partialorder %v459_v31, 0.0  ;;  %vm468_vm6 = vcmp.ge.f32.partialorder %v460_v32, 0.0  ;;  %vm469_vm7 = vcmp.ge.f32.partialorder %v461_v33, 0.0  ;;  %vm470_vm8 = vcmp.ge.f32.partialorder %v462_v34, 0.0 }
 0x148   : > { %v471_v35 = vmul.f32 0.01, %v455_v27  ;;  %v472_v36 = vmul.f32 0.01, %v456_v28  ;;  %v473_v37 = vmul.f32 0.01, %v457_v29 }
 0x149   : > { %v474_v38 = vmul.f32 0.01, %v458_v30  ;;  %v475_v39 = vmul.f32 0.01, %v459_v31  ;;  %v476_v40 = vmul.f32 0.01, %v460_v32 }
 0x14a   : > { %v477_v41 = vmul.f32 0.01, %v461_v33  ;;  %v478_v42 = vmul.f32 0.01, %v462_v34  ;;  %v479_v43 = vsel %vm463_vm1, %v455_v27, %v471_v35  ;;  %v480_v44 = vsel %vm464_vm2, %v456_v28, %v472_v36 }
 0x14b   : > { %v481_v45 = vsel %vm465_vm3, %v457_v29, %v473_v37  ;;  %v482_v46 = vsel %vm466_vm4, %v458_v30, %v474_v38  ;;  %v483_v47 = vsel %vm467_vm5, %v459_v31, %v475_v39  ;;  %v484_v48 = vsel %vm468_vm6, %v460_v32, %v476_v40  ;;  %487 = vst.msk [vmem:[%s221_s18] sm:$0xff] %vm391_vm0, %v479_v43 }
 0x14c   : > { %488 = vst.msk [vmem:[%s221_s18 + $0x8] sm:$0xff] %vm391_vm0, %v480_v44  ;;  %v485_v49 = vsel %vm469_vm7, %v461_v33, %v477_v41  ;;  %v486_v50 = vsel %vm470_vm8, %v462_v34, %v478_v42  ;;  %489 = vst.msk [vmem:[%s221_s18 + $0x10] sm:$0xff] %vm391_vm0, %v481_v45 }
 0x14d   : > { %490 = vst.msk [vmem:[%s221_s18 + $0x18] sm:$0xff] %vm391_vm0, %v482_v46  ;;  %491 = vst.msk [vmem:[%s221_s18 + $0x20] sm:$0xff] %vm391_vm0, %v483_v47 }
 0x14e   : > { %492 = vst.msk [vmem:[%s221_s18 + $0x28] sm:$0xff] %vm391_vm0, %v484_v48  ;;  %493 = vst.msk [vmem:[%s221_s18 + $0x30] sm:$0xff] %vm391_vm0, %v485_v49 }
 0x14f   : > { %494 = vst.msk [vmem:[%s221_s18 + $0x38] sm:$0xff] %vm391_vm0, %v486_v50 }
 0x150 PF: > { %s13_s14 = sadd.s32 1, %s740_s14   ;;  %s868_s12 = smov %s736_s13 }
 0x151   : > { %p10_p5 = scmp.ge.s32.totalorder %s13_s14, 4   ;;  %s869_s13 = smov %s871_s15 }
 0x153   :  { %12 = sbr.rel (!%p10_p5) target bundleno = 2 (0x2), region = 68 }

// kernel: discriminator_forward.7
= control target key start
LH: loop header
LB: loop body
LE: loop exit
PB: predicated region body
PF: predicated region fallthrough
CT: control target
= control target key end

     0   :  { %s699_s12 = smov 0   ;;  %s701_s13 = smov 0   ;;  %s796_s0 = inlined_call_operand.vmem [shape: bf16[2,16,256], index: 0, kind: input, shape index: {}]   ;;  %s797_s1 = inlined_call_operand.vmem [shape: bf16[256,32], index: 1, kind: input, shape index: {}]   ;;  %s798_s2 = inlined_call_operand.vmem [shape: f32[1,32], index: 2, kind: input, shape index: {}]   ;;  %s799_s3 = inlined_call_operand.vmem [shape: f32[2,16,32], index: 3, kind: output, shape index: {}]  }
   0x1   :  { %s703_s14 = smov 0  }
   0x2 LB: > { %s25_s15 = sadd.s32 1, %s673_s13  ;;  %p560_p0 = scmp.ge.s32.totalorder %s677_s14, 1  ;;  %s677_s14 = sphi %s703_s14, %s13_s14   ;;  %s673_s13 = sphi %s701_s13, %s801_s13   ;;  %s669_s12 = sphi %s699_s12, %s800_s12  }
   0x3   : > { %p27_p1 = scmp.ge.s32.totalorder %s25_s15, 2  ;;  %p168_p2 = scmp.lt.s32.totalorder %s677_s14, 3 }
   0x5   : > { %s803_s15 = smov (%p27_p1, %s25_s15), 0  ;;  %p169_p3 = pnand %p560_p0, %p168_p2 }
   0x6   : > { %p202_p4 = scmp.lt.s32.totalorder (!%p169_p3), %s669_s12, 1 }
   0x7   : > { %172 = sbr.rel (%p169_p3) target bundleno = 308 (0x134), region = 32 }
   0xc   : > { %v634_v0 = vld [vmem:[%s797_s1 + $0x78] sm:$0xff]   ;;  %v636_v2 = vld [vmem:[%s797_s1 + $0x70] sm:$0xff]   ;;  %v638_v4 = vld [vmem:[%s797_s1 + $0x68] sm:$0xff]   ;;  %s805_s12 = smov (!%p202_p4, %s669_s12), 1  ;;  %vm411_vm0 = vcmask 261120  }
   0xd   : > { %v635_v1 = vld [vmem:[%s797_s1 + $0x38] sm:$0xff]   ;;  %588 = vmatprep.subr.bf16.mxu0 %v634_v0  ;;  %v637_v3 = vld [vmem:[%s797_s1 + $0x30] sm:$0xff]   ;;  %v639_v5 = vld [vmem:[%s797_s1 + $0x28] sm:$0xff]   ;;  %s586_s5 = sshll.u32 %s805_s12, 4 }
   0xe   : > { %589 = vmatpush3.bf16.msra.mxu0 %v635_v1  ;;  %v640_v6 = vld [vmem:[%s797_s1 + $0x60] sm:$0xff]   ;;  %v642_v8 = vld [vmem:[%s797_s1 + $0x58] sm:$0xff]   ;;  %s206_s10 = scalar_lea.vmem %s796_s0, %s586_s5  ;;  %v644_v10 = vld [vmem:[%s797_s1 + $0x50] sm:$0xff]   ;;  %s221_s7 = scalar_lea.vmem %s799_s3, %s586_s5 }
   0xf   : > { %590 = vmatprep.subr.bf16.mxu0 %v636_v2  ;;  %v641_v7 = vld [vmem:[%s797_s1 + $0x20] sm:$0xff]   ;;  %v643_v9 = vld [vmem:[%s797_s1 + $0x18] sm:$0xff]   ;;  %v645_v12 = vld [vmem:[%s797_s1 + $0x10] sm:$0xff]  }
  0x10   : > { %v652_v11 = vld [vmem:[%s206_s10 + $0x4] ss:$8 sps:$4 sm:$0xff]   ;;  %v650_v17 = vld [vmem:[%s206_s10] ss:$8 sps:$4 sm:$0xff]  }
  0x11   : > { %402 = vmatprep.mubr.bf16.mxu0 %v652_v11  ;;  %v646_v13 = vld [vmem:[%s797_s1 + $0x48] sm:$0xff]   ;;  %v648_v15 = vld [vmem:[%s797_s1 + $0x40] sm:$0xff]  }
  0x12   : > { %591 = vmatpush3.bf16.msra.mxu0 %v637_v3  ;;  %v647_v14 = vld [vmem:[%s797_s1 + $0x8] sm:$0xff]   ;;  %v649_v16 = vld [vmem:[%s797_s1] sm:$0xff]  }
  0x13   : > { %592 = vmatprep.subr.bf16.mxu0 %v638_v4  ;;  %v565_v21 = vld [vmem:[%s798_s2] ss:$0 sm:$0xff] }
  0x16   : > { %593 = vmatpush3.bf16.msra.mxu0 %v639_v5 }
  0x17   : > { %594 = vmatprep.subr.bf16.mxu0 %v640_v6 }
  0x1a   : > { %595 = vmatpush3.bf16.msra.mxu0 %v641_v7 }
  0x1b   : > { %596 = vmatprep.subr.bf16.mxu0 %v642_v8 }
  0x1e   : > { %597 = vmatpush3.bf16.msra.mxu0 %v643_v9 }
  0x1f   : > { %598 = vmatprep.subr.bf16.mxu0 %v644_v10 }
  0x22   : > { %599 = vmatpush3.bf16.msra.mxu0 %v645_v12 }
  0x23   : > { %600 = vmatprep.subr.bf16.mxu0 %v646_v13 }
  0x26   : > { %601 = vmatpush3.bf16.msra.mxu0 %v647_v14 }
  0x27   : > { %602 = vmatprep.subr.bf16.mxu0 %v648_v15 }
  0x2a   : > { %603 = vmatpush3.bf16.msra.mxu0 %v649_v16 }
  0x2d   : > { %403 = vmatmul.mubr.bf16.vlgmr.msra.gmra.mxu0 %v650_v17 }
  0xed   : > { %v604_v18 = vpop.f32.mrf.mxu0 }
  0xef   : > { %v605_v19 = vpop.f32.mrf.mxu0 }
  0xf0   : > { %v606_v20 = vadd.f32 %v605_v19, %v604_v18 }
  0xf1   : > { %v607_v22 = vpop.f32.mrf.mxu0 }
  0xf2   : > { %v405_v24 = vadd.f32 %v606_v20, %v565_v21 }
  0xf3   : > { %v608_v23 = vpop.f32.mrf.mxu0 }
  0xf4   : > { %v609_v25 = vadd.f32 %v608_v23, %v607_v22  ;;  %v412_v27 = vsel %vm411_vm0, %v405_v24, 0.0 }
  0xf6   : > { %v408_v26 = vadd.f32 %v609_v25, %v565_v21 }
  0xf8   : > { %v413_v28 = vsel %vm411_vm0, %v408_v26, 0.0 }
  0xf9   : > { %v414_v29 = vadd.f32 %v413_v28, %v412_v27 }
  0xfb   : > { %v415_v30 = vrot.slane %v414_v29, 4 }
  0xfd   : > { %v416_v31 = vadd.f32 %v415_v30, %v414_v29 }
  0xff   : > { %v417_v32 = vrot.slane %v416_v31, 2 }
 0x101   : > { %v418_v33 = vadd.f32 %v417_v32, %v416_v31 }
 0x103   : > { %v419_v34 = vrot.slane %v418_v33, 1 }
 0x105   : > { %v420_v35 = vadd.f32 %v419_v34, %v418_v33 }
 0x107   : > { %v422_v36 = vmul.f32 0.0625, %v420_v35 }
 0x109   : > { %v423_v37 = vsub.f32 %v405_v24, %v422_v36  ;;  %v424_v38 = vsub.f32 %v408_v26, %v422_v36 }
 0x10b   : > { %v425_v39 = vmul.f32 %v423_v37, %v423_v37  ;;  %v426_v40 = vmul.f32 %v424_v38, %v424_v38 }
 0x10d   : > { %v427_v41 = vsel %vm411_vm0, %v425_v39, 0.0  ;;  %v428_v42 = vsel %vm411_vm0, %v426_v40, 0.0 }
 0x10e   : > { %v429_v43 = vadd.f32 %v428_v42, %v427_v41 }
 0x110   : > { %v430_v44 = vrot.slane %v429_v43, 4 }
 0x112   : > { %v431_v45 = vadd.f32 %v430_v44, %v429_v43 }
 0x114   : > { %v432_v46 = vrot.slane %v431_v45, 2 }
 0x116   : > { %v433_v47 = vadd.f32 %v432_v46, %v431_v45 }
 0x118   : > { %v434_v48 = vrot.slane %v433_v47, 1 }
 0x11a   : > { %v435_v49 = vadd.f32 %v434_v48, %v433_v47 }
 0x11c   : > { %v436_v50 = vmul.f32 0.0625, %v435_v49 }
 0x11e   : > { %v437_v51 = vadd.f32 1e-05, %v436_v50 }
 0x120   : > { %653 = vrsqrt.f32 %v437_v51 }
 0x12d   : > { %v654_v52 = vpop.eup %653 }
 0x12e   : > { %v439_v53 = vmul.f32 %v654_v52, %v423_v37  ;;  %v440_v54 = vmul.f32 %v654_v52, %v424_v38 }
 0x130   : > { %vm441_vm1 = vcmp.ge.f32.partialorder %v439_v53, 0.0  ;;  %vm442_vm2 = vcmp.ge.f32.partialorder %v440_v54, 0.0  ;;  %v443_v55 = vmul.f32 0.01, %v439_v53  ;;  %v444_v56 = vmul.f32 0.01, %v440_v54 }
 0x132   : > { %v445_v57 = vsel %vm441_vm1, %v439_v53, %v443_v55  ;;  %v446_v58 = vsel %vm442_vm2, %v440_v54, %v444_v56 }
 0x133   : > { %447 = vst.msk [vmem:[%s221_s7] sm:$0xff] %vm411_vm0, %v445_v57  ;;  %448 = vst.msk [vmem:[%s221_s7 + $0x8] sm:$0xff] %vm411_vm0, %v446_v58 }
 0x134 PF: > { %s13_s14 = sadd.s32 1, %s677_s14   ;;  %s800_s12 = smov %s673_s13 }
 0x135   : > { %p10_p5 = scmp.ge.s32.totalorder %s13_s14, 4   ;;  %s801_s13 = smov %s803_s15 }
 0x137   :  { %12 = sbr.rel (!%p10_p5) target bundleno = 2 (0x2), region = 68 }

// kernel: discriminator_forward.8
= control target key start
LH: loop header
LB: loop body
LE: loop exit
PB: predicated region body
PF: predicated region fallthrough
CT: control target
= control target key end

     0   :  { %s908_s12 = smov 0   ;;  %s910_s13 = smov 0   ;;  %s1051_s0 = inlined_call_operand.vmem [shape: bf16[2,4,512], index: 0, kind: input, shape index: {}]   ;;  %s1052_s1 = inlined_call_operand.vmem [shape: bf16[512,64], index: 1, kind: input, shape index: {}]   ;;  %s1053_s2 = inlined_call_operand.vmem [shape: f32[1,64], index: 2, kind: input, shape index: {}]   ;;  %s1054_s3 = inlined_call_operand.vmem [shape: f32[2,4,64], index: 3, kind: output, shape index: {}]  }
   0x1   :  { %s912_s14 = smov 0  }
   0x2 LB: > { %s25_s15 = sadd.s32 1, %s881_s13  ;;  %p719_p0 = scmp.ge.s32.totalorder %s885_s14, 1  ;;  %s885_s14 = sphi %s912_s14, %s13_s14   ;;  %s881_s13 = sphi %s910_s13, %s1056_s13   ;;  %s877_s12 = sphi %s908_s12, %s1055_s12  }
   0x3   : > { %p27_p1 = scmp.ge.s32.totalorder %s25_s15, 2  ;;  %p168_p2 = scmp.lt.s32.totalorder %s885_s14, 3 }
   0x5   : > { %s1058_s15 = smov (%p27_p1, %s25_s15), 0  ;;  %p169_p3 = pnand %p719_p0, %p168_p2 }
   0x6   : > { %p201_p4 = scmp.lt.s32.totalorder (!%p169_p3), %s877_s12, 1 }
   0x7   : > { %172 = sbr.rel (%p169_p3) target bundleno = 303 (0x12f), region = 32 }
   0xc   : > { %v828_v0 = vld [vmem:[%s1052_s1 + $0x78] sm:$0xff]   ;;  %v832_v4 = vld [vmem:[%s1052_s1 + $0x70] sm:$0xff]   ;;  %v836_v8 = vld [vmem:[%s1052_s1 + $0x68] sm:$0xff]   ;;  %s1060_s12 = smov (!%p201_p4, %s877_s12), 1  ;;  %v298_v30 = vlaneseq  ;;  %v887_v34 = vmov 1983009808  }
   0xd   : > { %v829_v1 = vld [vmem:[%s1052_s1 + $0xf8] sm:$0xff]   ;;  %759 = vmatprep.subr.bf16.mxu0 %v828_v0  ;;  %v833_v5 = vld [vmem:[%s1052_s1 + $0xf0] sm:$0xff]   ;;  %v837_v9 = vld [vmem:[%s1052_s1 + $0xe8] sm:$0xff]   ;;  %s758_s24 = sshll.u32 %s1060_s12, 3  ;;  %v296_v35 = vunpack.c.l.s4 %v887_v34  ;;  %vm587_vm0 = vcmask 519168   ;;  %s722_s17 = sshll.u32 %s1060_s12, 2 }
   0xe   : > { %v830_v2 = vld [vmem:[%s1052_s1 + $0x38] sm:$0xff]   ;;  %781 = vmatprep.subr.bf16.mxu1 %v829_v1  ;;  %v834_v6 = vld [vmem:[%s1052_s1 + $0x30] sm:$0xff]   ;;  %v838_v10 = vld [vmem:[%s1052_s1 + $0x28] sm:$0xff]   ;;  %s205_s6 = scalar_lea.vmem %s1051_s0, %s758_s24  ;;  %v299_v36 = vshrl.u32 %v298_v30, 7  ;;  %s219_s20 = scalar_lea.vmem %s1054_s3, %s722_s17 }
   0xf   : > { %v831_v3 = vld [vmem:[%s1052_s1 + $0xb8] sm:$0xff]   ;;  %760 = vmatpush3.bf16.msra.mxu0 %v830_v2  ;;  %v835_v7 = vld [vmem:[%s1052_s1 + $0xb0] sm:$0xff]   ;;  %v839_v11 = vld [vmem:[%s1052_s1 + $0xa8] sm:$0xff]   ;;  %v297_v37 = vunpack.c.0.s8 %v296_v35 }
  0x10   : > { %782 = vmatpush3.bf16.msra.mxu1 %v831_v3  ;;  %761 = vmatprep.subr.bf16.mxu0 %v832_v4  ;;  %v840_v12 = vld [vmem:[%s1052_s1 + $0x60] sm:$0xff]   ;;  %v844_v16 = vld [vmem:[%s1052_s1 + $0x58] sm:$0xff]   ;;  %v848_v20 = vld [vmem:[%s1052_s1 + $0x50] sm:$0xff]  }
  0x11   : > { %783 = vmatprep.subr.bf16.mxu1 %v833_v5  ;;  %v841_v13 = vld [vmem:[%s1052_s1 + $0xe0] sm:$0xff]   ;;  %v845_v17 = vld [vmem:[%s1052_s1 + $0xd8] sm:$0xff]   ;;  %v849_v21 = vld [vmem:[%s1052_s1 + $0xd0] sm:$0xff]   ;;  %v300_v39 = vsub.s32 %v297_v37, %v299_v36 }
  0x12   : > { %v842_v14 = vld [vmem:[%s1052_s1 + $0x20] sm:$0xff]   ;;  %v846_v18 = vld [vmem:[%s1052_s1 + $0x18] sm:$0xff]   ;;  %v850_v22 = vld [vmem:[%s1052_s1 + $0x10] sm:$0xff]  }
  0x13   : > { %762 = vmatpush3.bf16.msra.mxu0 %v834_v6  ;;  %v843_v15 = vld [vmem:[%s1052_s1 + $0xa0] sm:$0xff]   ;;  %v847_v19 = vld [vmem:[%s1052_s1 + $0x98] sm:$0xff]   ;;  %v851_v23 = vld [vmem:[%s1052_s1 + $0x90] sm:$0xff]  }
  0x14   : > { %784 = vmatpush3.bf16.msra.mxu1 %v835_v7  ;;  %763 = vmatprep.subr.bf16.mxu0 %v836_v8  ;;  %v852_v24 = vld [vmem:[%s1052_s1 + $0x48] sm:$0xff]   ;;  %v856_v28 = vld [vmem:[%s1052_s1 + $0x40] sm:$0xff]  }
  0x15   : > { %785 = vmatprep.subr.bf16.mxu1 %v837_v9  ;;  %v853_v25 = vld [vmem:[%s1052_s1 + $0xc8] sm:$0xff]   ;;  %v857_v29 = vld [vmem:[%s1052_s1 + $0xc0] sm:$0xff]  }
  0x16   : > { %v854_v26 = vld [vmem:[%s1052_s1 + $0x8] sm:$0xff]   ;;  %v858_v31 = vld [vmem:[%s1052_s1] sm:$0xff]  }
  0x17   : > { %764 = vmatpush3.bf16.msra.mxu0 %v838_v10  ;;  %v855_v27 = vld [vmem:[%s1052_s1 + $0x88] sm:$0xff]   ;;  %v859_v32 = vld [vmem:[%s1052_s1 + $0x80] sm:$0xff]  }
  0x18   : > { %786 = vmatpush3.bf16.msra.mxu1 %v839_v11  ;;  %765 = vmatprep.subr.bf16.mxu0 %v840_v12  ;;  %v221_v33 = vld [vmem:[%s205_s6] sm:$0xff] }
  0x19   : > { %787 = vmatprep.subr.bf16.mxu1 %v841_v13  ;;  %v294_v38 = vcombine.high %v221_v33, %v221_v33  ;;  %v301_v40 = vrot.slane %v221_v33, %v300_v39  ;;  %v723_v46 = vld [vmem:[%s1053_s2] ss:$0 sm:$0xff] }
  0x1b   : > { %766 = vmatpush3.bf16.msra.mxu0 %v842_v14  ;;  %v308_v41 = vrot.slane %v294_v38, %v300_v39  ;;  %v309_v42 = vcombine.high %v301_v40, %v301_v40 }
  0x1c   : > { %788 = vmatpush3.bf16.msra.mxu1 %v843_v15  ;;  %767 = vmatprep.subr.bf16.mxu0 %v844_v16 }
  0x1d   : > { %789 = vmatprep.subr.bf16.mxu1 %v845_v17  ;;  %v310_v43 = vcombine.high %v308_v41, %v308_v41  ;;  %539 = vmatprep.mubr.bf16.mxu0 %v309_v42 }
  0x1f   : > { %768 = vmatpush3.bf16.msra.mxu0 %v846_v18  ;;  %579 = vmatprep.mubr.bf16.mxu1 %v310_v43 }
  0x20   : > { %790 = vmatpush3.bf16.msra.mxu1 %v847_v19  ;;  %769 = vmatprep.subr.bf16.mxu0 %v848_v20 }
  0x21   : > { %791 = vmatprep.subr.bf16.mxu1 %v849_v21 }
  0x23   : > { %770 = vmatpush3.bf16.msra.mxu0 %v850_v22 }
  0x24   : > { %792 = vmatpush3.bf16.msra.mxu1 %v851_v23  ;;  %771 = vmatprep.subr.bf16.mxu0 %v852_v24 }
  0x25   : > { %793 = vmatprep.subr.bf16.mxu1 %v853_v25 }
  0x27   : > { %772 = vmatpush3.bf16.msra.mxu0 %v854_v26 }
  0x28   : > { %794 = vmatpush3.bf16.msra.mxu1 %v855_v27  ;;  %773 = vmatprep.subr.bf16.mxu0 %v856_v28 }
  0x29   : > { %795 = vmatprep.subr.bf16.mxu1 %v857_v29 }
  0x2b   : > { %774 = vmatpush3.bf16.msra.mxu0 %v858_v31 }
  0x2c   : > { %796 = vmatpush3.bf16.msra.mxu1 %v859_v32 }
  0x2e   : > { %540 = vmatmul.mubr.bf16.vlgmr.msra.gmra.mxu0 %v301_v40 }
  0x2f   : > { %580 = vmatmul.mubr.bf16.vlgmr.msra.gmra.mxu1 %v308_v41 }
  0xee   : > { %v775_v44 = vpop.f32.mrf.mxu0 }
  0xef   : > { %v797_v45 = vpop.f32.mrf.mxu1 }
  0xf0   : > { %v776_v47 = vpop.f32.mrf.mxu0 }
  0xf1   : > { %v798_v48 = vpop.f32.mrf.mxu1  ;;  %v777_v49 = vadd.f32 %v776_v47, %v775_v44 }
  0xf2   : > { %v778_v50 = vpop.f32.mrf.mxu0  ;;  %v799_v53 = vadd.f32 %v798_v48, %v797_v45 }
  0xf3   : > { %v800_v51 = vpop.f32.mrf.mxu1  ;;  %v542_v52 = vadd.f32 %v777_v49, %v723_v46 }
  0xf4   : > { %v779_v54 = vpop.f32.mrf.mxu0 }
  0xf5   : > { %v801_v55 = vpop.f32.mrf.mxu1  ;;  %v582_v56 = vadd.f32 %v799_v53, %v542_v52 }
  0xf7   : > { %v588_v57 = vsel %vm587_vm0, %v582_v56, 0.0 }
  0xf8   : > { %v589_v58 = vrot.slane %v588_v57, 4 }
  0xfa   : > { %v590_v59 = vadd.f32 %v589_v58, %v588_v57 }
  0xfc   : > { %v591_v60 = vrot.slane %v590_v59, 2 }
  0xfe   : > { %v592_v61 = vadd.f32 %v591_v60, %v590_v59 }
 0x100   : > { %v593_v62 = vrot.slane %v592_v61, 1 }
 0x102   : > { %v594_v63 = vadd.f32 %v593_v62, %v592_v61 }
 0x104   : > { %v596_v0 = vmul.f32 0.25, %v594_v63 }
 0x106   : > { %v597_v1 = vsub.f32 %v582_v56, %v596_v0 }
 0x108   : > { %v598_v2 = vmul.f32 %v597_v1, %v597_v1 }
 0x10a   : > { %v599_v3 = vsel %vm587_vm0, %v598_v2, 0.0 }
 0x10b   : > { %v600_v4 = vrot.slane %v599_v3, 4 }
 0x10d   : > { %v601_v5 = vadd.f32 %v600_v4, %v599_v3 }
 0x10f   : > { %v602_v6 = vrot.slane %v601_v5, 2 }
 0x111   : > { %v603_v7 = vadd.f32 %v602_v6, %v601_v5 }
 0x113   : > { %v604_v8 = vrot.slane %v603_v7, 1 }
 0x115   : > { %v605_v9 = vadd.f32 %v604_v8, %v603_v7 }
 0x117   : > { %v606_v10 = vmul.f32 0.25, %v605_v9 }
 0x119   : > { %v607_v11 = vadd.f32 1e-05, %v606_v10 }
 0x11b   : > { %861 = vrsqrt.f32 %v607_v11 }
 0x128   : > { %v862_v12 = vpop.eup %861 }
 0x129   : > { %v609_v13 = vmul.f32 %v862_v12, %v597_v1 }
 0x12b   : > { %vm610_vm1 = vcmp.ge.f32.partialorder %v609_v13, 0.0  ;;  %v611_v14 = vmul.f32 0.01, %v609_v13 }
 0x12d   : > { %v612_v15 = vsel %vm610_vm1, %v609_v13, %v611_v14 }
 0x12e   : > { %613 = vst.msk [vmem:[%s219_s20] sm:$0xf] %vm587_vm0, %v612_v15 }
 0x12f PF: > { %s13_s14 = sadd.s32 1, %s885_s14   ;;  %s1055_s12 = smov %s881_s13 }
 0x130   : > { %p10_p5 = scmp.ge.s32.totalorder %s13_s14, 4   ;;  %s1056_s13 = smov %s1058_s15 }
 0x132   :  { %12 = sbr.rel (!%p10_p5) target bundleno = 2 (0x2), region = 68 }

// kernel: discriminator_forward.9
= control target key start
LH: loop header
LB: loop body
LE: loop exit
PB: predicated region body
PF: predicated region fallthrough
CT: control target
= control target key end

     0   :  { %v294_v6 = vmov 1966171168   ;;  %v69_v8 = vlaneseq  ;;  %s380_s1 = inlined_call_operand.vmem [shape: bf16[256,128], index: 1, kind: input, shape index: {}]   ;;  %s381_s0 = inlined_call_operand.vmem [shape: bf16[2,256], index: 0, kind: input, shape index: {}]   ;;  %s382_s2 = inlined_call_operand.vmem [shape: f32[1,128], index: 2, kind: input, shape index: {}]   ;;  %s383_s4 = inlined_call_operand.vmem [shape: f32[2,128], index: 4, kind: output, shape index: {1}]   ;;  %s384_s3 = inlined_call_operand.vmem [shape: f32[2,128], index: 3, kind: output, shape index: {0}]  }
   0x1   :  { %v274_v0 = vld [vmem:[%s380_s1 + $0x78] sm:$0xff]   ;;  %v276_v2 = vld [vmem:[%s380_s1 + $0x70] sm:$0xff]   ;;  %v278_v4 = vld [vmem:[%s380_s1 + $0x68] sm:$0xff]   ;;  %v67_v7 = vunpack.c.l.s4 %v294_v6 }
   0x2   :  { %v275_v1 = vld [vmem:[%s380_s1 + $0x38] sm:$0xff]   ;;  %251 = vmatprep.subr.bf16.mxu0 %v274_v0  ;;  %v277_v3 = vld [vmem:[%s380_s1 + $0x30] sm:$0xff]   ;;  %v279_v5 = vld [vmem:[%s380_s1 + $0x28] sm:$0xff]   ;;  %v70_v12 = vshrl.u32 %v69_v8, 7 }
   0x3   :  { %252 = vmatpush3.bf16.msra.mxu0 %v275_v1  ;;  %v280_v9 = vld [vmem:[%s380_s1 + $0x60] sm:$0xff]   ;;  %v68_v11 = vunpack.c.0.s8 %v67_v7  ;;  %v282_v13 = vld [vmem:[%s380_s1 + $0x58] sm:$0xff]   ;;  %v284_v16 = vld [vmem:[%s380_s1 + $0x50] sm:$0xff]  }
   0x4   :  { %253 = vmatprep.subr.bf16.mxu0 %v276_v2  ;;  %v281_v10 = vld [vmem:[%s380_s1 + $0x20] sm:$0xff]   ;;  %v283_v14 = vld [vmem:[%s380_s1 + $0x18] sm:$0xff]   ;;  %v285_v19 = vld [vmem:[%s380_s1 + $0x10] sm:$0xff]  }
   0x5   :  { %v71_v15 = vsub.s32 %v68_v11, %v70_v12  ;;  %v234_v17 = vld.sshfl [vmem:[%s381_s0] sm:$0x11 pattern:$0x75316420]  ;;  %v286_v21 = vld [vmem:[%s380_s1 + $0x48] sm:$0xff]  }
   0x6   :  { %v65_v18 = vcombine.high %v234_v17, %v234_v17  ;;  %v287_v22 = vld [vmem:[%s380_s1 + $0x8] sm:$0xff]   ;;  %v288_v23 = vld [vmem:[%s380_s1 + $0x40] sm:$0xff]  }
   0x7   :  { %254 = vmatpush3.bf16.msra.mxu0 %v277_v3  ;;  %v289_v24 = vld [vmem:[%s380_s1] sm:$0xff]   ;;  %v72_v25 = vrot.slane %v234_v17, %v71_v15 }
   0x8   :  { %255 = vmatprep.subr.bf16.mxu0 %v278_v4  ;;  %v79_v20 = vrot.slane %v65_v18, %v71_v15  ;;  %v233_v27 = vld [vmem:[%s382_s2] ss:$0 sm:$0xff] }
   0xa   :  { %210 = vmatprep.mubr.bf16.mxu0 %v79_v20 }
   0xb   :  { %256 = vmatpush3.bf16.msra.mxu0 %v279_v5 }
   0xc   :  { %257 = vmatprep.subr.bf16.mxu0 %v280_v9 }
   0xf   :  { %258 = vmatpush3.bf16.msra.mxu0 %v281_v10 }
  0x10   :  { %259 = vmatprep.subr.bf16.mxu0 %v282_v13 }
  0x13   :  { %260 = vmatpush3.bf16.msra.mxu0 %v283_v14 }
  0x14   :  { %261 = vmatprep.subr.bf16.mxu0 %v284_v16 }
  0x17   :  { %262 = vmatpush3.bf16.msra.mxu0 %v285_v19 }
  0x18   :  { %263 = vmatprep.subr.bf16.mxu0 %v286_v21 }
  0x1b   :  { %264 = vmatpush3.bf16.msra.mxu0 %v287_v22 }
  0x1c   :  { %265 = vmatprep.subr.bf16.mxu0 %v288_v23 }
  0x1f   :  { %266 = vmatpush3.bf16.msra.mxu0 %v289_v24 }
  0x22   :  { %211 = vmatmul.mubr.bf16.vlgmr.msra.gmra.mxu0 %v72_v25 }
  0xe2   :  { %v267_v26 = vpop.f32.mrf.mxu0 }
  0xe4   :  { %v268_v28 = vpop.f32.mrf.mxu0 }
  0xe5   :  { %v269_v29 = vadd.f32 %v268_v28, %v267_v26 }
  0xe6   :  { %v270_v30 = vpop.f32.mrf.mxu0 }
  0xe7   :  { %v213_v31 = vadd.f32 %v269_v29, %v233_v27 }
  0xe8   :  { %v271_v32 = vpop.f32.mrf.mxu0 }
  0xe9   :  { %218 = vst [vmem:[%s383_s4] sm:$0x3] %v213_v31  ;;  %v219_v33 = vsub.f32 0.0, %v213_v31 }
  0xeb   :  { %v220_v34 = vmul.f32 1.442695, %v219_v33 }
  0xed   :  { %290 = vpow2.f32 %v220_v34 }
  0xfa   :  { %v291_v35 = vpop.eup %290 }
  0xfb   :  { %v222_v36 = vadd.f32 1.0, %v291_v35 }
  0xfd   :  { %292 = vrcp.f32 %v222_v36 }
 0x10a   :  { %v293_v37 = vpop.eup %292 }
 0x10b   :  { %224 = vst [vmem:[%s384_s3] sm:$0x3] %v293_v37 }

</bundles_post_ra>
